<compile_context>
chip_gen: v6e
topology: v6e:2x2x1
jax: 0.10.0
libtpu: 0.0.40
codegen_flags: <defaults>
</compile_context>

<pallas_src>
import functools

import jax
import jax.numpy as jnp
from jax.experimental import pallas as pl
from jax.experimental.pallas import tpu as pltpu

MIN_NORM = 1e-15          # geoopt clamp_min
BALL_EPS = 4e-3           # geoopt projection eps for float32
CURVATURE = 1.0           # Poincare ball c


def _round_up(n, m):
    return (n + m - 1) // m * m


# ----------------------------- shared scalar helpers ---------------------------------
def _artanh(x):
    x = jnp.clip(x, -1.0 + 1e-7, 1.0 - 1e-7)
    return 0.5 * (jnp.log1p(x) - jnp.log1p(-x))


def _norm(x):
    return jnp.sqrt(jnp.sum(x * x, axis=-1, keepdims=True))


# ----------------------------- fused hyperbolic math (kernel path) -------------------
def _scaled_res_from_fac(v, fac, sqrt_c, maxnorm):
    """geoopt mobius_matvec / mobius_pointwise_mul tail.

    v   : M x  (or w*x);   fac = artanh(sqrt_c*||x||)/||x|| (column, precomputed).
    All scalar math on the (B,1) column; one full-width multiply.  Projection is folded
    into the same column factor.  Returns (projected result, squared norm of result).
    The exact-zero guard of geoopt is unnecessary here: v == 0 -> result exactly 0.
    """
    v_sq = jnp.sum(v * v, axis=-1, keepdims=True)
    v_norm_raw = jnp.sqrt(v_sq)
    v_norm = jnp.maximum(v_norm_raw, MIN_NORM)
    col = jnp.tanh(v_norm * fac) / (v_norm * sqrt_c)          # (B,1)
    res_norm = jnp.maximum(v_norm_raw * col, MIN_NORM)        # ||res|| (clamped)
    proj = jnp.where(res_norm > maxnorm, maxnorm / res_norm, 1.0)
    res = v * (col * proj)
    out_norm = jnp.minimum(res_norm, maxnorm)
    return res, out_norm * out_norm


def _mobius_add_fused(x, y, c, sqrt_c, maxnorm, x2=None, y2=None):
    """Mobius add with projection folded in; reuses precomputed squared norms.

    Returns (projected result, squared norm of result).  Divide happens only on the
    (B,1) column (proj/den); one full-width multiply produces the result.
    """
    if x2 is None:
        x2 = jnp.sum(x * x, axis=-1, keepdims=True)
    if y2 is None:
        y2 = jnp.sum(y * y, axis=-1, keepdims=True)
    xy = jnp.sum(x * y, axis=-1, keepdims=True)
    a = 1.0 + 2.0 * c * xy + c * y2
    b = 1.0 - c * x2
    num = a * x + b * y
    den = jnp.maximum(1.0 + 2.0 * c * xy + c * c * x2 * y2, MIN_NORM)
    num_norm = jnp.sqrt(jnp.sum(num * num, axis=-1, keepdims=True))
    res_norm = jnp.maximum(num_norm / den, MIN_NORM)          # ||num/den|| (clamped)
    proj = jnp.where(res_norm > maxnorm, maxnorm / res_norm, 1.0)
    res = num * (proj / den)
    out_norm = jnp.minimum(res_norm, maxnorm)
    return res, out_norm * out_norm


def _logmap0_from_sq(y, y_sq, sqrt_c):
    """logmap0 reusing the already-known squared norm of y (one broadcast mul)."""
    y_norm = jnp.maximum(jnp.sqrt(y_sq), MIN_NORM)
    return y * (_artanh(sqrt_c * y_norm) / (y_norm * sqrt_c))


# ----------------------------- fused in-kernel cell step -----------------------------
def _cell_step(h, h_sq, ux, wzr_ref, whh_ref, b_z, b_r, b_h, bz_sq, br_sq, bh_sq,
               lane_mask, c, sqrt_c, maxnorm, hp):
    ux_z = ux[:, :hp]
    ux_r = ux[:, hp:2 * hp]
    ux_h = ux[:, 2 * hp:]

    # Shared ||h|| / artanh column factor for BOTH h-dependent gate matvecs.
    h_norm = jnp.maximum(jnp.sqrt(h_sq), MIN_NORM)
    h_fac = _artanh(sqrt_c * h_norm) / h_norm

    # Fused z/r gate matmul: weights read from VMEM at the dot site (no vreg hoist).
    mx_zr = jnp.dot(h, wzr_ref[...], preferred_element_type=jnp.float32)   # (B, 2*hp)
    wh_z, whz_sq = _scaled_res_from_fac(mx_zr[:, :hp], h_fac, sqrt_c, maxnorm)
    wh_r, whr_sq = _scaled_res_from_fac(mx_zr[:, hp:], h_fac, sqrt_c, maxnorm)

    # NOTE: mobius_add is non-associative; keep (W h (+) U x) (+) b ordering.
    sz, sz_sq = _mobius_add_fused(wh_z, ux_z, c, sqrt_c, maxnorm, x2=whz_sq)
    zz, zz_sq = _mobius_add_fused(sz, b_z, c, sqrt_c, maxnorm, x2=sz_sq, y2=bz_sq)
    z = jax.nn.sigmoid(_logmap0_from_sq(zz, zz_sq, sqrt_c))

    sr, sr_sq = _mobius_add_fused(wh_r, ux_r, c, sqrt_c, maxnorm, x2=whr_sq)
    rr, rr_sq = _mobius_add_fused(sr, b_r, c, sqrt_c, maxnorm, x2=sr_sq, y2=br_sq)
    r = jax.nn.sigmoid(_logmap0_from_sq(rr, rr_sq, sqrt_c))

    if lane_mask is not None:
        # sigmoid(0)=0.5 in zero-padded lanes; z/r feed lane reductions below.
        z = z * lane_mask
        r = r * lane_mask

    # r_point_h = mobius_pointwise_mul(w=h, x=r): scale factor comes from ||r||.
    r_sq = jnp.sum(r * r, axis=-1, keepdims=True)
    r_norm = jnp.maximum(jnp.sqrt(r_sq), MIN_NORM)
    r_fac = _artanh(sqrt_c * r_norm) / r_norm
    r_point_h, rh_sq = _scaled_res_from_fac(h * r, r_fac, sqrt_c, maxnorm)

    rh_norm = jnp.maximum(jnp.sqrt(rh_sq), MIN_NORM)
    rh_fac = _artanh(sqrt_c * rh_norm) / rh_norm
    mx_h = jnp.dot(r_point_h, whh_ref[...], preferred_element_type=jnp.float32)
    wh_h, whh_sq = _scaled_res_from_fac(mx_h, rh_fac, sqrt_c, maxnorm)

    sh, sh_sq = _mobius_add_fused(wh_h, ux_h, c, sqrt_c, maxnorm, x2=whh_sq)
    h_tilde, ht_sq = _mobius_add_fused(sh, b_h, c, sqrt_c, maxnorm, x2=sh_sq, y2=bh_sq)

    # (-h) (+) h_tilde : reuse ||h||^2 as x2.
    mhot, _ = _mobius_add_fused(-h, h_tilde, c, sqrt_c, maxnorm, x2=h_sq, y2=ht_sq)

    # mobius_pointwise_mul(w=mhot, x=z): scale factor comes from ||z||.
    z_sq = jnp.sum(z * z, axis=-1, keepdims=True)
    z_norm = jnp.maximum(jnp.sqrt(z_sq), MIN_NORM)
    z_fac = _artanh(sqrt_c * z_norm) / z_norm
    delta, d_sq = _scaled_res_from_fac(mhot * z, z_fac, sqrt_c, maxnorm)

    new_h, new_h_sq = _mobius_add_fused(h, delta, c, sqrt_c, maxnorm, x2=h_sq, y2=d_sq)
    return new_h, new_h_sq


# ----------------------------- Pallas kernel ----------------------------------------
def hyper_gru_kernel(ux_ref, wzr_ref, whh_ref, b_ref, out_ref, h_scratch,
                     *, t_blk, h_real, hp, c):
    # Zero the carried hidden state at the start of every sequence (seq axis is axis 1).
    @pl.when(pl.program_id(1) == 0)
    def _():
        h_scratch[...] = jnp.zeros_like(h_scratch)

    cc = jnp.float32(c)
    sqrt_c = jnp.sqrt(cc)
    maxnorm = (1.0 - BALL_EPS) / sqrt_c

    # Hoisted per-block constants: biases and their squared norms (constant over t).
    b_all = b_ref[...]                       # (3, hp)
    b_z = b_all[0:1, :]
    b_r = b_all[1:2, :]
    b_h = b_all[2:3, :]
    bz_sq = jnp.sum(b_z * b_z, axis=-1, keepdims=True)
    br_sq = jnp.sum(b_r * b_r, axis=-1, keepdims=True)
    bh_sq = jnp.sum(b_h * b_h, axis=-1, keepdims=True)

    if h_real != hp:
        lane_mask = (jax.lax.broadcasted_iota(jnp.int32, (1, hp), 1)
                     < h_real).astype(jnp.float32)
    else:
        lane_mask = None

    h0 = h_scratch[...]
    h0_sq = jnp.sum(h0 * h0, axis=-1, keepdims=True)

    def step(t, carry):
        h, h_sq = carry
        new_h, new_h_sq = _cell_step(h, h_sq, ux_ref[t], wzr_ref, whh_ref,
                                     b_z, b_r, b_h, bz_sq, br_sq, bh_sq,
                                     lane_mask, cc, sqrt_c, maxnorm, hp)
        out_ref[t] = new_h
        return new_h, new_h_sq

    # Serially-dependent chain: no unroll (keeps vreg pressure / code size down).
    h_fin, _ = jax.lax.fori_loop(0, t_blk, step, (h0, h0_sq), unroll=False)
    h_scratch[...] = h_fin


# ----------------------------- hoisted x-only GEMM (plain JAX) -----------------------
def _precompute_ux(x_sbi, u_z, u_r, u_h, c):
    """mobius_matvec(u_g, x_t) for all timesteps and all 3 gates with ONE GEMM."""
    S, B, I = x_sbi.shape
    H = u_z.shape[0]
    sqrt_c = jnp.sqrt(c)
    maxnorm = (1.0 - BALL_EPS) / sqrt_c
    xf = x_sbi.reshape(S * B, I)
    u_all_t = jnp.concatenate([u_z, u_r, u_h], axis=0).T                  # (I, 3H)
    mx_all = jnp.dot(xf, u_all_t, preferred_element_type=jnp.float32)     # (S*B, 3H)
    x_norm = jnp.maximum(_norm(xf), MIN_NORM)
    x_fac = _artanh(sqrt_c * x_norm) / x_norm                             # shared over gates
    outs = []
    for g in range(3):
        res, _ = _scaled_res_from_fac(mx_all[:, g * H:(g + 1) * H], x_fac, sqrt_c, maxnorm)
        outs.append(res.reshape(S, B, H))
    return outs


# ----------------------------- wrapper ------------------------------------------------
def hyper_gru(x, params, *, t_blk=8):
    """x: (batch, seq, input_size) -> (batch, seq, hidden_size)."""
    B, S, I = x.shape
    H = params["w_z"].shape[0]
    c = jnp.float32(CURVATURE)
    f32 = lambda a: jnp.asarray(a, jnp.float32)

    x_t = jnp.transpose(x, (1, 0, 2)).astype(jnp.float32)                 # (S, B, I)

    # Hoist the x-only Mobius matvecs out of the serial recurrence.
    ux_z, ux_r, ux_h = _precompute_ux(
        x_t, f32(params["u_z"]), f32(params["u_r"]), f32(params["u_h"]), c)

    # Pad batch -> sublane multiple (8), hidden -> lane multiple (128), seq -> T block.
    BP = _round_up(B, 8)
    HP = _round_up(H, 128)
    t_blk = max(1, min(t_blk, S))
    SP = _round_up(S, t_blk)
    # Batch block: split in two when possible so megacore (v7x) can shard batch.
    b_blk = BP // 2 if (BP % 16 == 0) else BP

    pad_sbh = lambda a: jnp.pad(a, ((0, SP - S), (0, BP - B), (0, HP - H)))
    pad_w = lambda w: jnp.pad(f32(w), ((0, HP - H), (0, HP - H)))
    pad_b = lambda b: jnp.pad(f32(b).reshape(1, H), ((0, 0), (0, HP - H)))

    # One packed (SP, BP, 3*HP) input stream; gate g lives at lanes [g*HP, (g+1)*HP).
    ux = jnp.concatenate([pad_sbh(ux_z), pad_sbh(ux_r), pad_sbh(ux_h)], axis=-1)

    # Pre-transpose weights on the host and fuse the z/r gate matrices into one.
    w_zr_t = jnp.concatenate([pad_w(params["w_z"]).T, pad_w(params["w_r"]).T], axis=1)
    w_h_t = pad_w(params["w_h"]).T
    b_all = jnp.concatenate([pad_b(params["b_z"]), pad_b(params["b_r"]),
                             pad_b(params["b_h"])], axis=0)               # (3, HP)

    kernel = functools.partial(hyper_gru_kernel, t_blk=t_blk, h_real=H, hp=HP,
                               c=float(CURVATURE))

    grid = (BP // b_blk, SP // t_blk)

    # VMEM budget (generous estimate, clamped to [16 MiB, 64 MiB]).
    vmem_need = 4 * (2 * t_blk * b_blk * 3 * HP            # packed ux (double-buffered)
                     + 2 * t_blk * b_blk * HP              # output (double-buffered)
                     + 2 * (HP * 2 * HP + HP * HP + 3 * HP)  # weights / biases
                     + b_blk * HP)                         # hidden-state scratch
    vmem_limit = int(min(max(4 * vmem_need, 16 * 1024 * 1024), 64 * 1024 * 1024))

    # Advisory cost estimate: flops are tiny but the serial chain is long.
    cost = pl.CostEstimate(
        flops=int(2 * SP * BP * HP * 3 * HP + 150 * SP * BP * HP),
        transcendentals=int(30 * SP * BP * HP),
        bytes_accessed=int(4 * (SP * BP * 4 * HP + HP * 3 * HP + 3 * HP)),
    )

    out = pl.pallas_call(
        kernel,
        out_shape=jax.ShapeDtypeStruct((SP, BP, HP), jnp.float32),
        grid_spec=pltpu.PrefetchScalarGridSpec(
            num_scalar_prefetch=0,
            grid=grid,
            in_specs=[
                pl.BlockSpec((t_blk, b_blk, 3 * HP), lambda b, t: (t, b, 0)),  # packed ux
                pl.BlockSpec((HP, 2 * HP), lambda b, t: (0, 0)),               # [w_z^T|w_r^T]
                pl.BlockSpec((HP, HP), lambda b, t: (0, 0)),                   # w_h^T
                pl.BlockSpec((3, HP), lambda b, t: (0, 0)),                    # biases
            ],
            out_specs=pl.BlockSpec((t_blk, b_blk, HP), lambda b, t: (t, b, 0)),
            scratch_shapes=[pltpu.VMEM((b_blk, HP), jnp.float32)],  # carried hidden state
        ),
        compiler_params=pltpu.CompilerParams(
            dimension_semantics=("parallel", "arbitrary"),
            vmem_limit_bytes=vmem_limit),
        cost_estimate=cost,
    )(ux, w_zr_t, w_h_t, b_all)

    return jnp.transpose(out[:S, :B, :H], (1, 0, 2))               # (B, S, H)


# ----------------------------- pure-JAX reference (geoopt formulas, unfused) ---------
def _project(x, c):
    norm = jnp.maximum(_norm(x), MIN_NORM)
    maxnorm = (1.0 - BALL_EPS) / jnp.sqrt(c)
    return jnp.where(norm > maxnorm, x / norm * maxnorm, x)


def _mobius_add(x, y, c):
    x2 = jnp.sum(x * x, axis=-1, keepdims=True)
    y2 = jnp.sum(y * y, axis=-1, keepdims=True)
    xy = jnp.sum(x * y, axis=-1, keepdims=True)
    num = (1.0 + 2.0 * c * xy + c * y2) * x + (1.0 - c * x2) * y
    den = 1.0 + 2.0 * c * xy + c * c * x2 * y2
    res = num / jnp.maximum(den, MIN_NORM)
    return _project(res, c)


def _mobius_matvec(m, x, c):
    sqrt_c = jnp.sqrt(c)
    x_norm = jnp.maximum(_norm(x), MIN_NORM)
    mx = jnp.dot(x, m.T, preferred_element_type=jnp.float32)
    mx_norm = jnp.maximum(_norm(mx), MIN_NORM)
    res_c = jnp.tanh(mx_norm / x_norm * _artanh(sqrt_c * x_norm)) * mx / (mx_norm * sqrt_c)
    cond = jnp.all(mx == 0.0, axis=-1, keepdims=True)
    res = jnp.where(cond, 0.0, res_c)
    return _project(res, c)


def _mobius_pointwise_mul(w, x, c):
    sqrt_c = jnp.sqrt(c)
    x_norm = jnp.maximum(_norm(x), MIN_NORM)
    wx = w * x
    wx_norm = jnp.maximum(_norm(wx), MIN_NORM)
    res_c = jnp.tanh(wx_norm / x_norm * _artanh(sqrt_c * x_norm)) * wx / (wx_norm * sqrt_c)
    cond = jnp.all(wx == 0.0, axis=-1, keepdims=True)
    res = jnp.where(cond, 0.0, res_c)
    return _project(res, c)


def _logmap0(y, c):
    sqrt_c = jnp.sqrt(c)
    y_norm = jnp.maximum(_norm(y), MIN_NORM)
    return y / y_norm / sqrt_c * _artanh(sqrt_c * y_norm)


def _cell_step_ref(x, h, wz, wr, wh, uz, ur, uh, bz, br, bh, c):
    def transition(W, hvec, U, xvec, b):
        Wh = _mobius_matvec(W, hvec, c)
        Ux = _mobius_matvec(U, xvec, c)
        return _mobius_add(_mobius_add(Wh, Ux, c), b, c)

    z = jax.nn.sigmoid(_logmap0(transition(wz, h, uz, x, bz), c))
    r = jax.nn.sigmoid(_logmap0(transition(wr, h, ur, x, br), c))
    r_point_h = _mobius_pointwise_mul(h, r, c)
    h_tilde = transition(wh, r_point_h, uh, x, bh)
    minus_h_oplus_htilde = _mobius_add(-h, h_tilde, c)
    return _mobius_add(h, _mobius_pointwise_mul(minus_h_oplus_htilde, z, c), c)


def hyper_gru_ref(x, params):
    c = jnp.float32(CURVATURE)
    B = x.shape[0]
    H = params["w_z"].shape[0]
    x_t = jnp.transpose(x, (1, 0, 2)).astype(jnp.float32)

    def step(h, xt):
        new_h = _cell_step_ref(xt, h,
                               params["w_z"], params["w_r"], params["w_h"],
                               params["u_z"], params["u_r"], params["u_h"],
                               params["b_z"], params["b_r"], params["b_h"], c)
        return new_h, new_h

    _, outs = jax.lax.scan(step, jnp.zeros((B, H), jnp.float32), x_t)
    return jnp.transpose(outs, (1, 0, 2))


# ----------------------------- main ---------------------------------------------------
if __name__ == "__main__":
    B, S, I, H = 2, 8, 4, 32

    key = jax.random.PRNGKey(0)
    k_wz, k_wr, k_wh, k_uz, k_ur, k_uh, k_x = jax.random.split(key, 7)
    k = (1.0 / H) ** 0.5

    params = {
        "w_z": jax.random.uniform(k_wz, (H, H), jnp.float32, -k, k),
        "w_r": jax.random.uniform(k_wr, (H, H), jnp.float32, -k, k),
        "w_h": jax.random.uniform(k_wh, (H, H), jnp.float32, -k, k),
        "u_z": jax.random.uniform(k_uz, (H, I), jnp.float32, -k, k),
        "u_r": jax.random.uniform(k_ur, (H, I), jnp.float32, -k, k),
        "u_h": jax.random.uniform(k_uh, (H, I), jnp.float32, -k, k),
        "b_z": jnp.zeros((1, H), jnp.float32),
        "b_r": jnp.zeros((1, H), jnp.float32),
        "b_h": jnp.zeros((1, H), jnp.float32),
    }

    # hyp_x is assumed to be points inside the unit Poincare ball -> keep norms small.
    x = jax.random.uniform(k_x, (B, S, I), jnp.float32, -0.1, 0.1)

    out = jax.block_until_ready(hyper_gru(x, params))
    ref = jax.block_until_ready(hyper_gru_ref(x, params))

    assert out.shape == (B, S, H)
    assert jnp.all(jnp.isfinite(out))
    assert jnp.allclose(out, ref, atol=5e-5, rtol=5e-5)

    print("KERNEL_OK")
</pallas_src>

<mosaic_0001>
module attributes {stable_mosaic.version = 11 : i64} {
  func.func @hyper_gru_kernel(%arg0: i32, %arg1: i32, %arg2: memref<8x8x384xf32, #tpu.memory_space<vmem>>, %arg3: memref<128x256xf32, #tpu.memory_space<vmem>>, %arg4: memref<128x128xf32, #tpu.memory_space<vmem>>, %arg5: memref<3x128xf32, #tpu.memory_space<vmem>>, %arg6: memref<8x8x128xf32, #tpu.memory_space<vmem>>, %arg7: memref<8x128xf32, #tpu.memory_space<vmem>>) attributes {dimension_semantics = [#tpu.dimension_semantics<parallel>, #tpu.dimension_semantics<arbitrary>], iteration_bounds = array<i64: 1, 1>, scalar_prefetch = 0 : i64, scratch_operands = 1 : i64, tpu.core_type = #tpu.core_type<tc>, window_params = [{transform_indices = @transform_0, window_bounds = array<i64: 8, 8, 384>}, {pipeline_mode = #tpu.pipeline_mode<synchronous>, transform_indices = @transform_1, window_bounds = array<i64: 128, 256>}, {pipeline_mode = #tpu.pipeline_mode<synchronous>, transform_indices = @transform_2, window_bounds = array<i64: 128, 128>}, {pipeline_mode = #tpu.pipeline_mode<synchronous>, transform_indices = @transform_3, window_bounds = array<i64: 3, 128>}, {transform_indices = @transform_4, window_bounds = array<i64: 8, 8, 128>}]} {
    %c0_i32 = arith.constant 0 : i32
    %0 = arith.cmpi eq, %arg1, %c0_i32 : i32
    %1 = arith.extui %0 : i1 to i32
    %c0_i32_0 = arith.constant 0 : i32
    %2 = arith.cmpi ne, %1, %c0_i32_0 : i32
    scf.if %2 {
      %cst_14 = arith.constant 0.000000e+00 : f32
      %30 = vector.broadcast %cst_14 : f32 to vector<8x128xf32>
      %c0_15 = arith.constant 0 : index
      %c0_16 = arith.constant 0 : index
      %31 = vector.load %arg7[%c0_15, %c0_16] : memref<8x128xf32, #tpu.memory_space<vmem>>, vector<8x128xf32>
      tpu.vector_store %arg7[%c0_15, %c0_16], %30 {strides = array<i32>} : memref<8x128xf32, #tpu.memory_space<vmem>>, vector<8x128xf32>,
    } else {
    }
    %cst = arith.constant 1.000000e+00 : f32
    %3 = math.sqrt %cst : f32
    %cst_1 = arith.constant 0.995999991 : f32
    %4 = arith.divf %cst_1, %3 : f32
    %c0 = arith.constant 0 : index
    %c0_2 = arith.constant 0 : index
    %5 = vector.load %arg5[%c0, %c0_2] : memref<3x128xf32, #tpu.memory_space<vmem>>, vector<3x128xf32>
    %6 = vector.extract_strided_slice %5 {offsets = [0, 0], sizes = [1, 128], strides = [1, 1]} : vector<3x128xf32> to vector<1x128xf32>
    %7 = vector.extract_strided_slice %5 {offsets = [1, 0], sizes = [1, 128], strides = [1, 1]} : vector<3x128xf32> to vector<1x128xf32>
    %8 = vector.extract_strided_slice %5 {offsets = [2, 0], sizes = [1, 128], strides = [1, 1]} : vector<3x128xf32> to vector<1x128xf32>
    %9 = arith.mulf %6, %6 : vector<1x128xf32>
    %cst_3 = arith.constant dense<0.000000e+00> : vector<1xf32>
    %10 = vector.multi_reduction <add>, %9, %cst_3 [1] : vector<1x128xf32> to vector<1xf32>
    %11 = vector.shape_cast %10 : vector<1xf32> to vector<1x1xf32>
    %12 = arith.mulf %7, %7 : vector<1x128xf32>
    %cst_4 = arith.constant dense<0.000000e+00> : vector<1xf32>
    %13 = vector.multi_reduction <add>, %12, %cst_4 [1] : vector<1x128xf32> to vector<1xf32>
    %14 = vector.shape_cast %13 : vector<1xf32> to vector<1x1xf32>
    %15 = arith.mulf %8, %8 : vector<1x128xf32>
    %cst_5 = arith.constant dense<0.000000e+00> : vector<1xf32>
    %16 = vector.multi_reduction <add>, %15, %cst_5 [1] : vector<1x128xf32> to vector<1xf32>
    %17 = vector.shape_cast %16 : vector<1xf32> to vector<1x1xf32>
    %18 = tpu.iota {dimensions = array<i32: 1>} : vector<1x128xi32>
    %c32_i32 = arith.constant 32 : i32
    %19 = vector.broadcast %c32_i32 : i32 to vector<1x128xi32>
    %20 = arith.cmpi slt, %18, %19 : vector<1x128xi32>
    %21 = arith.extui %20 : vector<1x128xi1> to vector<1x128xi32>
    %22 = arith.sitofp %21 : vector<1x128xi32> to vector<1x128xf32>
    %c0_6 = arith.constant 0 : index
    %c0_7 = arith.constant 0 : index
    %23 = vector.load %arg7[%c0_6, %c0_7] : memref<8x128xf32, #tpu.memory_space<vmem>>, vector<8x128xf32>
    %24 = arith.mulf %23, %23 : vector<8x128xf32>
    %cst_8 = arith.constant dense<0.000000e+00> : vector<8xf32>
    %25 = vector.multi_reduction <add>, %24, %cst_8 [1] : vector<8x128xf32> to vector<8xf32>
    %26 = vector.shape_cast %25 : vector<8xf32> to vector<8x1xf32>
    %cst_9 = arith.constant 1.000000e+00 : f32
    %c0_i32_10 = arith.constant 0 : i32
    %c8_i32 = arith.constant 8 : i32
    %27 = arith.addi %c0_i32_10, %c8_i32 : i32
    %c1_i32 = arith.constant 1 : i32
    %28:2 = scf.for %arg8 = %c0_i32_10 to %27 step %c1_i32 iter_args(%arg9 = %23, %arg10 = %26) -> (vector<8x128xf32>, vector<8x1xf32>)  : i32 {
      %30 = arith.index_cast %arg8 : i32 to index
      %c0_14 = arith.constant 0 : index
      %c0_15 = arith.constant 0 : index
      %31 = vector.load %arg2[%30, %c0_14, %c0_15] : memref<8x8x384xf32, #tpu.memory_space<vmem>>, vector<1x8x384xf32>
      %32 = vector.shape_cast %31 : vector<1x8x384xf32> to vector<8x384xf32>
      %33 = vector.extract_strided_slice %32 {offsets = [0, 0], sizes = [8, 128], strides = [1, 1]} : vector<8x384xf32> to vector<8x128xf32>
      %34 = vector.extract_strided_slice %32 {offsets = [0, 128], sizes = [8, 128], strides = [1, 1]} : vector<8x384xf32> to vector<8x128xf32>
      %35 = vector.extract_strided_slice %32 {offsets = [0, 256], sizes = [8, 128], strides = [1, 1]} : vector<8x384xf32> to vector<8x128xf32>
      %36 = math.sqrt %arg10 : vector<8x1xf32>
      %cst_16 = arith.constant 1.000000e-15 : f32
      %37 = vector.broadcast %cst_16 : f32 to vector<8x1xf32>
      %38 = arith.maximumf %36, %37 : vector<8x1xf32>
      %39 = vector.broadcast %3 : f32 to vector<8x1xf32>
      %40 = arith.mulf %39, %38 : vector<8x1xf32>
      %cst_17 = arith.constant -0.99999988 : f32
      %cst_18 = arith.constant 0.99999988 : f32
      %41 = vector.broadcast %cst_17 : f32 to vector<8x1xf32>
      %42 = arith.maximumf %41, %40 : vector<8x1xf32>
      %43 = vector.broadcast %cst_18 : f32 to vector<8x1xf32>
      %44 = arith.minimumf %43, %42 : vector<8x1xf32>
      %45 = math.log1p %44 : vector<8x1xf32>
      %cst_19 = arith.constant 0.000000e+00 : f32
      %46 = vector.broadcast %cst_19 : f32 to vector<8x1xf32>
      %47 = arith.subf %46, %44 : vector<8x1xf32>
      %48 = math.log1p %47 : vector<8x1xf32>
      %49 = arith.subf %45, %48 : vector<8x1xf32>
      %cst_20 = arith.constant 5.000000e-01 : f32
      %50 = vector.broadcast %cst_20 : f32 to vector<8x1xf32>
      %51 = arith.mulf %50, %49 : vector<8x1xf32>
      %52 = arith.divf %51, %38 : vector<8x1xf32>
      %c0_21 = arith.constant 0 : index
      %c0_22 = arith.constant 0 : index
      %53 = vector.load %arg3[%c0_21, %c0_22] : memref<128x256xf32, #tpu.memory_space<vmem>>, vector<128x256xf32>
      %cst_23 = arith.constant dense<0.000000e+00> : vector<8x256xf32>
      %54 = tpu.matmul %arg9, %53, %cst_23 {dimension_numbers = #tpu.dot_dimension_numbers<[1], [0], [0], [1], [0, 0, 1, 1], [], []>} : vector<8x128xf32>, vector<128x256xf32>, vector<8x256xf32> -> vector<8x256xf32>
      %55 = vector.extract_strided_slice %54 {offsets = [0, 0], sizes = [8, 128], strides = [1, 1]} : vector<8x256xf32> to vector<8x128xf32>
      %56 = arith.mulf %55, %55 : vector<8x128xf32>
      %cst_24 = arith.constant dense<0.000000e+00> : vector<8xf32>
      %57 = vector.multi_reduction <add>, %56, %cst_24 [1] : vector<8x128xf32> to vector<8xf32>
      %58 = vector.shape_cast %57 : vector<8xf32> to vector<8x1xf32>
      %59 = math.sqrt %58 : vector<8x1xf32>
      %cst_25 = arith.constant 1.000000e-15 : f32
      %60 = vector.broadcast %cst_25 : f32 to vector<8x1xf32>
      %61 = arith.maximumf %59, %60 : vector<8x1xf32>
      %62 = arith.mulf %61, %52 : vector<8x1xf32>
      %63 = math.tanh %62 : vector<8x1xf32>
      %64 = vector.broadcast %3 : f32 to vector<8x1xf32>
      %65 = arith.mulf %61, %64 : vector<8x1xf32>
      %66 = arith.divf %63, %65 : vector<8x1xf32>
      %67 = arith.mulf %59, %66 : vector<8x1xf32>
      %cst_26 = arith.constant 1.000000e-15 : f32
      %68 = vector.broadcast %cst_26 : f32 to vector<8x1xf32>
      %69 = arith.maximumf %67, %68 : vector<8x1xf32>
      %70 = vector.broadcast %4 : f32 to vector<8x1xf32>
      %71 = arith.cmpf ogt, %69, %70 : vector<8x1xf32>
      %72 = vector.broadcast %4 : f32 to vector<8x1xf32>
      %73 = arith.divf %72, %69 : vector<8x1xf32>
      %cst_27 = arith.constant 1.000000e+00 : f32
      %74 = vector.broadcast %cst_27 : f32 to vector<8x1xf32>
      %75 = arith.select %71, %73, %74 : vector<8x1xi1>, vector<8x1xf32>
      %76 = arith.mulf %66, %75 : vector<8x1xf32>
      %77 = vector.broadcast %76 : vector<8x1xf32> to vector<8x128xf32>
      %78 = arith.mulf %55, %77 : vector<8x128xf32>
      %79 = vector.broadcast %4 : f32 to vector<8x1xf32>
      %80 = arith.minimumf %69, %79 : vector<8x1xf32>
      %81 = arith.mulf %80, %80 : vector<8x1xf32>
      %82 = vector.extract_strided_slice %54 {offsets = [0, 128], sizes = [8, 128], strides = [1, 1]} : vector<8x256xf32> to vector<8x128xf32>
      %83 = arith.mulf %82, %82 : vector<8x128xf32>
      %cst_28 = arith.constant dense<0.000000e+00> : vector<8xf32>
      %84 = vector.multi_reduction <add>, %83, %cst_28 [1] : vector<8x128xf32> to vector<8xf32>
      %85 = vector.shape_cast %84 : vector<8xf32> to vector<8x1xf32>
      %86 = math.sqrt %85 : vector<8x1xf32>
      %cst_29 = arith.constant 1.000000e-15 : f32
      %87 = vector.broadcast %cst_29 : f32 to vector<8x1xf32>
      %88 = arith.maximumf %86, %87 : vector<8x1xf32>
      %89 = arith.mulf %88, %52 : vector<8x1xf32>
      %90 = math.tanh %89 : vector<8x1xf32>
      %91 = vector.broadcast %3 : f32 to vector<8x1xf32>
      %92 = arith.mulf %88, %91 : vector<8x1xf32>
      %93 = arith.divf %90, %92 : vector<8x1xf32>
      %94 = arith.mulf %86, %93 : vector<8x1xf32>
      %cst_30 = arith.constant 1.000000e-15 : f32
      %95 = vector.broadcast %cst_30 : f32 to vector<8x1xf32>
      %96 = arith.maximumf %94, %95 : vector<8x1xf32>
      %97 = vector.broadcast %4 : f32 to vector<8x1xf32>
      %98 = arith.cmpf ogt, %96, %97 : vector<8x1xf32>
      %99 = vector.broadcast %4 : f32 to vector<8x1xf32>
      %100 = arith.divf %99, %96 : vector<8x1xf32>
      %cst_31 = arith.constant 1.000000e+00 : f32
      %101 = vector.broadcast %cst_31 : f32 to vector<8x1xf32>
      %102 = arith.select %98, %100, %101 : vector<8x1xi1>, vector<8x1xf32>
      %103 = arith.mulf %93, %102 : vector<8x1xf32>
      %104 = vector.broadcast %103 : vector<8x1xf32> to vector<8x128xf32>
      %105 = arith.mulf %82, %104 : vector<8x128xf32>
      %106 = vector.broadcast %4 : f32 to vector<8x1xf32>
      %107 = arith.minimumf %96, %106 : vector<8x1xf32>
      %108 = arith.mulf %107, %107 : vector<8x1xf32>
      %109 = arith.mulf %33, %33 : vector<8x128xf32>
      %cst_32 = arith.constant dense<0.000000e+00> : vector<8xf32>
      %110 = vector.multi_reduction <add>, %109, %cst_32 [1] : vector<8x128xf32> to vector<8xf32>
      %111 = vector.shape_cast %110 : vector<8xf32> to vector<8x1xf32>
      %112 = arith.mulf %78, %33 : vector<8x128xf32>
      %cst_33 = arith.constant dense<0.000000e+00> : vector<8xf32>
      %113 = vector.multi_reduction <add>, %112, %cst_33 [1] : vector<8x128xf32> to vector<8xf32>
      %114 = vector.shape_cast %113 : vector<8xf32> to vector<8x1xf32>
      %cst_34 = arith.constant 2.000000e+00 : f32
      %115 = arith.mulf %cst_34, %cst_9 : f32
      %116 = vector.broadcast %115 : f32 to vector<8x1xf32>
      %117 = arith.mulf %116, %114 : vector<8x1xf32>
      %cst_35 = arith.constant 1.000000e+00 : f32
      %118 = vector.broadcast %cst_35 : f32 to vector<8x1xf32>
      %119 = arith.addf %118, %117 : vector<8x1xf32>
      %120 = vector.broadcast %cst_9 : f32 to vector<8x1xf32>
      %121 = arith.mulf %120, %111 : vector<8x1xf32>
      %122 = arith.addf %119, %121 : vector<8x1xf32>
      %123 = vector.broadcast %cst_9 : f32 to vector<8x1xf32>
      %124 = arith.mulf %123, %81 : vector<8x1xf32>
      %cst_36 = arith.constant 1.000000e+00 : f32
      %125 = vector.broadcast %cst_36 : f32 to vector<8x1xf32>
      %126 = arith.subf %125, %124 : vector<8x1xf32>
      %127 = vector.broadcast %122 : vector<8x1xf32> to vector<8x128xf32>
      %128 = arith.mulf %127, %78 : vector<8x128xf32>
      %129 = vector.broadcast %126 : vector<8x1xf32> to vector<8x128xf32>
      %130 = arith.mulf %129, %33 : vector<8x128xf32>
      %131 = arith.addf %128, %130 : vector<8x128xf32>
      %cst_37 = arith.constant 2.000000e+00 : f32
      %132 = arith.mulf %cst_37, %cst_9 : f32
      %133 = vector.broadcast %132 : f32 to vector<8x1xf32>
      %134 = arith.mulf %133, %114 : vector<8x1xf32>
      %cst_38 = arith.constant 1.000000e+00 : f32
      %135 = vector.broadcast %cst_38 : f32 to vector<8x1xf32>
      %136 = arith.addf %135, %134 : vector<8x1xf32>
      %137 = arith.mulf %cst_9, %cst_9 : f32
      %138 = vector.broadcast %137 : f32 to vector<8x1xf32>
      %139 = arith.mulf %138, %81 : vector<8x1xf32>
      %140 = arith.mulf %139, %111 : vector<8x1xf32>
      %141 = arith.addf %136, %140 : vector<8x1xf32>
      %cst_39 = arith.constant 1.000000e-15 : f32
      %142 = vector.broadcast %cst_39 : f32 to vector<8x1xf32>
      %143 = arith.maximumf %141, %142 : vector<8x1xf32>
      %144 = arith.mulf %131, %131 : vector<8x128xf32>
      %cst_40 = arith.constant dense<0.000000e+00> : vector<8xf32>
      %145 = vector.multi_reduction <add>, %144, %cst_40 [1] : vector<8x128xf32> to vector<8xf32>
      %146 = vector.shape_cast %145 : vector<8xf32> to vector<8x1xf32>
      %147 = math.sqrt %146 : vector<8x1xf32>
      %148 = arith.divf %147, %143 : vector<8x1xf32>
      %cst_41 = arith.constant 1.000000e-15 : f32
      %149 = vector.broadcast %cst_41 : f32 to vector<8x1xf32>
      %150 = arith.maximumf %148, %149 : vector<8x1xf32>
      %151 = vector.broadcast %4 : f32 to vector<8x1xf32>
      %152 = arith.cmpf ogt, %150, %151 : vector<8x1xf32>
      %153 = vector.broadcast %4 : f32 to vector<8x1xf32>
      %154 = arith.divf %153, %150 : vector<8x1xf32>
      %cst_42 = arith.constant 1.000000e+00 : f32
      %155 = vector.broadcast %cst_42 : f32 to vector<8x1xf32>
      %156 = arith.select %152, %154, %155 : vector<8x1xi1>, vector<8x1xf32>
      %157 = arith.divf %156, %143 : vector<8x1xf32>
      %158 = vector.broadcast %157 : vector<8x1xf32> to vector<8x128xf32>
      %159 = arith.mulf %131, %158 : vector<8x128xf32>
      %160 = vector.broadcast %4 : f32 to vector<8x1xf32>
      %161 = arith.minimumf %150, %160 : vector<8x1xf32>
      %162 = arith.mulf %161, %161 : vector<8x1xf32>
      %163 = vector.broadcast %6 : vector<1x128xf32> to vector<8x128xf32>
      %164 = arith.mulf %159, %163 : vector<8x128xf32>
      %cst_43 = arith.constant dense<0.000000e+00> : vector<8xf32>
      %165 = vector.multi_reduction <add>, %164, %cst_43 [1] : vector<8x128xf32> to vector<8xf32>
      %166 = vector.shape_cast %165 : vector<8xf32> to vector<8x1xf32>
      %cst_44 = arith.constant 2.000000e+00 : f32
      %167 = arith.mulf %cst_44, %cst_9 : f32
      %168 = vector.broadcast %167 : f32 to vector<8x1xf32>
      %169 = arith.mulf %168, %166 : vector<8x1xf32>
      %cst_45 = arith.constant 1.000000e+00 : f32
      %170 = vector.broadcast %cst_45 : f32 to vector<8x1xf32>
      %171 = arith.addf %170, %169 : vector<8x1xf32>
      %172 = vector.broadcast %cst_9 : f32 to vector<1x1xf32>
      %173 = arith.mulf %172, %11 : vector<1x1xf32>
      %174 = vector.broadcast %173 : vector<1x1xf32> to vector<8x1xf32>
      %175 = arith.addf %171, %174 : vector<8x1xf32>
      %176 = vector.broadcast %cst_9 : f32 to vector<8x1xf32>
      %177 = arith.mulf %176, %162 : vector<8x1xf32>
      %cst_46 = arith.constant 1.000000e+00 : f32
      %178 = vector.broadcast %cst_46 : f32 to vector<8x1xf32>
      %179 = arith.subf %178, %177 : vector<8x1xf32>
      %180 = vector.broadcast %175 : vector<8x1xf32> to vector<8x128xf32>
      %181 = arith.mulf %180, %159 : vector<8x128xf32>
      %182 = vector.broadcast %179 : vector<8x1xf32> to vector<8x128xf32>
      %183 = vector.broadcast %6 : vector<1x128xf32> to vector<8x128xf32>
      %184 = arith.mulf %182, %183 : vector<8x128xf32>
      %185 = arith.addf %181, %184 : vector<8x128xf32>
      %cst_47 = arith.constant 2.000000e+00 : f32
      %186 = arith.mulf %cst_47, %cst_9 : f32
      %187 = vector.broadcast %186 : f32 to vector<8x1xf32>
      %188 = arith.mulf %187, %166 : vector<8x1xf32>
      %cst_48 = arith.constant 1.000000e+00 : f32
      %189 = vector.broadcast %cst_48 : f32 to vector<8x1xf32>
      %190 = arith.addf %189, %188 : vector<8x1xf32>
      %191 = arith.mulf %cst_9, %cst_9 : f32
      %192 = vector.broadcast %191 : f32 to vector<8x1xf32>
      %193 = arith.mulf %192, %162 : vector<8x1xf32>
      %194 = vector.broadcast %11 : vector<1x1xf32> to vector<8x1xf32>
      %195 = arith.mulf %193, %194 : vector<8x1xf32>
      %196 = arith.addf %190, %195 : vector<8x1xf32>
      %cst_49 = arith.constant 1.000000e-15 : f32
      %197 = vector.broadcast %cst_49 : f32 to vector<8x1xf32>
      %198 = arith.maximumf %196, %197 : vector<8x1xf32>
      %199 = arith.mulf %185, %185 : vector<8x128xf32>
      %cst_50 = arith.constant dense<0.000000e+00> : vector<8xf32>
      %200 = vector.multi_reduction <add>, %199, %cst_50 [1] : vector<8x128xf32> to vector<8xf32>
      %201 = vector.shape_cast %200 : vector<8xf32> to vector<8x1xf32>
      %202 = math.sqrt %201 : vector<8x1xf32>
      %203 = arith.divf %202, %198 : vector<8x1xf32>
      %cst_51 = arith.constant 1.000000e-15 : f32
      %204 = vector.broadcast %cst_51 : f32 to vector<8x1xf32>
      %205 = arith.maximumf %203, %204 : vector<8x1xf32>
      %206 = vector.broadcast %4 : f32 to vector<8x1xf32>
      %207 = arith.cmpf ogt, %205, %206 : vector<8x1xf32>
      %208 = vector.broadcast %4 : f32 to vector<8x1xf32>
      %209 = arith.divf %208, %205 : vector<8x1xf32>
      %cst_52 = arith.constant 1.000000e+00 : f32
      %210 = vector.broadcast %cst_52 : f32 to vector<8x1xf32>
      %211 = arith.select %207, %209, %210 : vector<8x1xi1>, vector<8x1xf32>
      %212 = arith.divf %211, %198 : vector<8x1xf32>
      %213 = vector.broadcast %212 : vector<8x1xf32> to vector<8x128xf32>
      %214 = arith.mulf %185, %213 : vector<8x128xf32>
      %215 = vector.broadcast %4 : f32 to vector<8x1xf32>
      %216 = arith.minimumf %205, %215 : vector<8x1xf32>
      %217 = arith.mulf %216, %216 : vector<8x1xf32>
      %218 = math.sqrt %217 : vector<8x1xf32>
      %cst_53 = arith.constant 1.000000e-15 : f32
      %219 = vector.broadcast %cst_53 : f32 to vector<8x1xf32>
      %220 = arith.maximumf %218, %219 : vector<8x1xf32>
      %221 = vector.broadcast %3 : f32 to vector<8x1xf32>
      %222 = arith.mulf %221, %220 : vector<8x1xf32>
      %cst_54 = arith.constant -0.99999988 : f32
      %cst_55 = arith.constant 0.99999988 : f32
      %223 = vector.broadcast %cst_54 : f32 to vector<8x1xf32>
      %224 = arith.maximumf %223, %222 : vector<8x1xf32>
      %225 = vector.broadcast %cst_55 : f32 to vector<8x1xf32>
      %226 = arith.minimumf %225, %224 : vector<8x1xf32>
      %227 = math.log1p %226 : vector<8x1xf32>
      %cst_56 = arith.constant 0.000000e+00 : f32
      %228 = vector.broadcast %cst_56 : f32 to vector<8x1xf32>
      %229 = arith.subf %228, %226 : vector<8x1xf32>
      %230 = math.log1p %229 : vector<8x1xf32>
      %231 = arith.subf %227, %230 : vector<8x1xf32>
      %cst_57 = arith.constant 5.000000e-01 : f32
      %232 = vector.broadcast %cst_57 : f32 to vector<8x1xf32>
      %233 = arith.mulf %232, %231 : vector<8x1xf32>
      %234 = vector.broadcast %3 : f32 to vector<8x1xf32>
      %235 = arith.mulf %220, %234 : vector<8x1xf32>
      %236 = arith.divf %233, %235 : vector<8x1xf32>
      %237 = vector.broadcast %236 : vector<8x1xf32> to vector<8x128xf32>
      %238 = arith.mulf %214, %237 : vector<8x128xf32>
      %239 = arith.negf %238 : vector<8x128xf32>
      %240 = math.exp %239 : vector<8x128xf32>
      %cst_58 = arith.constant 1.000000e+00 : f32
      %241 = vector.broadcast %cst_58 : f32 to vector<8x128xf32>
      %242 = arith.addf %241, %240 : vector<8x128xf32>
      %243 = arith.divf %241, %242 : vector<8x128xf32>
      %244 = arith.mulf %34, %34 : vector<8x128xf32>
      %cst_59 = arith.constant dense<0.000000e+00> : vector<8xf32>
      %245 = vector.multi_reduction <add>, %244, %cst_59 [1] : vector<8x128xf32> to vector<8xf32>
      %246 = vector.shape_cast %245 : vector<8xf32> to vector<8x1xf32>
      %247 = arith.mulf %105, %34 : vector<8x128xf32>
      %cst_60 = arith.constant dense<0.000000e+00> : vector<8xf32>
      %248 = vector.multi_reduction <add>, %247, %cst_60 [1] : vector<8x128xf32> to vector<8xf32>
      %249 = vector.shape_cast %248 : vector<8xf32> to vector<8x1xf32>
      %cst_61 = arith.constant 2.000000e+00 : f32
      %250 = arith.mulf %cst_61, %cst_9 : f32
      %251 = vector.broadcast %250 : f32 to vector<8x1xf32>
      %252 = arith.mulf %251, %249 : vector<8x1xf32>
      %cst_62 = arith.constant 1.000000e+00 : f32
      %253 = vector.broadcast %cst_62 : f32 to vector<8x1xf32>
      %254 = arith.addf %253, %252 : vector<8x1xf32>
      %255 = vector.broadcast %cst_9 : f32 to vector<8x1xf32>
      %256 = arith.mulf %255, %246 : vector<8x1xf32>
      %257 = arith.addf %254, %256 : vector<8x1xf32>
      %258 = vector.broadcast %cst_9 : f32 to vector<8x1xf32>
      %259 = arith.mulf %258, %108 : vector<8x1xf32>
      %cst_63 = arith.constant 1.000000e+00 : f32
      %260 = vector.broadcast %cst_63 : f32 to vector<8x1xf32>
      %261 = arith.subf %260, %259 : vector<8x1xf32>
      %262 = vector.broadcast %257 : vector<8x1xf32> to vector<8x128xf32>
      %263 = arith.mulf %262, %105 : vector<8x128xf32>
      %264 = vector.broadcast %261 : vector<8x1xf32> to vector<8x128xf32>
      %265 = arith.mulf %264, %34 : vector<8x128xf32>
      %266 = arith.addf %263, %265 : vector<8x128xf32>
      %cst_64 = arith.constant 2.000000e+00 : f32
      %267 = arith.mulf %cst_64, %cst_9 : f32
      %268 = vector.broadcast %267 : f32 to vector<8x1xf32>
      %269 = arith.mulf %268, %249 : vector<8x1xf32>
      %cst_65 = arith.constant 1.000000e+00 : f32
      %270 = vector.broadcast %cst_65 : f32 to vector<8x1xf32>
      %271 = arith.addf %270, %269 : vector<8x1xf32>
      %272 = arith.mulf %cst_9, %cst_9 : f32
      %273 = vector.broadcast %272 : f32 to vector<8x1xf32>
      %274 = arith.mulf %273, %108 : vector<8x1xf32>
      %275 = arith.mulf %274, %246 : vector<8x1xf32>
      %276 = arith.addf %271, %275 : vector<8x1xf32>
      %cst_66 = arith.constant 1.000000e-15 : f32
      %277 = vector.broadcast %cst_66 : f32 to vector<8x1xf32>
      %278 = arith.maximumf %276, %277 : vector<8x1xf32>
      %279 = arith.mulf %266, %266 : vector<8x128xf32>
      %cst_67 = arith.constant dense<0.000000e+00> : vector<8xf32>
      %280 = vector.multi_reduction <add>, %279, %cst_67 [1] : vector<8x128xf32> to vector<8xf32>
      %281 = vector.shape_cast %280 : vector<8xf32> to vector<8x1xf32>
      %282 = math.sqrt %281 : vector<8x1xf32>
      %283 = arith.divf %282, %278 : vector<8x1xf32>
      %cst_68 = arith.constant 1.000000e-15 : f32
      %284 = vector.broadcast %cst_68 : f32 to vector<8x1xf32>
      %285 = arith.maximumf %283, %284 : vector<8x1xf32>
      %286 = vector.broadcast %4 : f32 to vector<8x1xf32>
      %287 = arith.cmpf ogt, %285, %286 : vector<8x1xf32>
      %288 = vector.broadcast %4 : f32 to vector<8x1xf32>
      %289 = arith.divf %288, %285 : vector<8x1xf32>
      %cst_69 = arith.constant 1.000000e+00 : f32
      %290 = vector.broadcast %cst_69 : f32 to vector<8x1xf32>
      %291 = arith.select %287, %289, %290 : vector<8x1xi1>, vector<8x1xf32>
      %292 = arith.divf %291, %278 : vector<8x1xf32>
      %293 = vector.broadcast %292 : vector<8x1xf32> to vector<8x128xf32>
      %294 = arith.mulf %266, %293 : vector<8x128xf32>
      %295 = vector.broadcast %4 : f32 to vector<8x1xf32>
      %296 = arith.minimumf %285, %295 : vector<8x1xf32>
      %297 = arith.mulf %296, %296 : vector<8x1xf32>
      %298 = vector.broadcast %7 : vector<1x128xf32> to vector<8x128xf32>
      %299 = arith.mulf %294, %298 : vector<8x128xf32>
      %cst_70 = arith.constant dense<0.000000e+00> : vector<8xf32>
      %300 = vector.multi_reduction <add>, %299, %cst_70 [1] : vector<8x128xf32> to vector<8xf32>
      %301 = vector.shape_cast %300 : vector<8xf32> to vector<8x1xf32>
      %cst_71 = arith.constant 2.000000e+00 : f32
      %302 = arith.mulf %cst_71, %cst_9 : f32
      %303 = vector.broadcast %302 : f32 to vector<8x1xf32>
      %304 = arith.mulf %303, %301 : vector<8x1xf32>
      %cst_72 = arith.constant 1.000000e+00 : f32
      %305 = vector.broadcast %cst_72 : f32 to vector<8x1xf32>
      %306 = arith.addf %305, %304 : vector<8x1xf32>
      %307 = vector.broadcast %cst_9 : f32 to vector<1x1xf32>
      %308 = arith.mulf %307, %14 : vector<1x1xf32>
      %309 = vector.broadcast %308 : vector<1x1xf32> to vector<8x1xf32>
      %310 = arith.addf %306, %309 : vector<8x1xf32>
      %311 = vector.broadcast %cst_9 : f32 to vector<8x1xf32>
      %312 = arith.mulf %311, %297 : vector<8x1xf32>
      %cst_73 = arith.constant 1.000000e+00 : f32
      %313 = vector.broadcast %cst_73 : f32 to vector<8x1xf32>
      %314 = arith.subf %313, %312 : vector<8x1xf32>
      %315 = vector.broadcast %310 : vector<8x1xf32> to vector<8x128xf32>
      %316 = arith.mulf %315, %294 : vector<8x128xf32>
      %317 = vector.broadcast %314 : vector<8x1xf32> to vector<8x128xf32>
      %318 = vector.broadcast %7 : vector<1x128xf32> to vector<8x128xf32>
      %319 = arith.mulf %317, %318 : vector<8x128xf32>
      %320 = arith.addf %316, %319 : vector<8x128xf32>
      %cst_74 = arith.constant 2.000000e+00 : f32
      %321 = arith.mulf %cst_74, %cst_9 : f32
      %322 = vector.broadcast %321 : f32 to vector<8x1xf32>
      %323 = arith.mulf %322, %301 : vector<8x1xf32>
      %cst_75 = arith.constant 1.000000e+00 : f32
      %324 = vector.broadcast %cst_75 : f32 to vector<8x1xf32>
      %325 = arith.addf %324, %323 : vector<8x1xf32>
      %326 = arith.mulf %cst_9, %cst_9 : f32
      %327 = vector.broadcast %326 : f32 to vector<8x1xf32>
      %328 = arith.mulf %327, %297 : vector<8x1xf32>
      %329 = vector.broadcast %14 : vector<1x1xf32> to vector<8x1xf32>
      %330 = arith.mulf %328, %329 : vector<8x1xf32>
      %331 = arith.addf %325, %330 : vector<8x1xf32>
      %cst_76 = arith.constant 1.000000e-15 : f32
      %332 = vector.broadcast %cst_76 : f32 to vector<8x1xf32>
      %333 = arith.maximumf %331, %332 : vector<8x1xf32>
      %334 = arith.mulf %320, %320 : vector<8x128xf32>
      %cst_77 = arith.constant dense<0.000000e+00> : vector<8xf32>
      %335 = vector.multi_reduction <add>, %334, %cst_77 [1] : vector<8x128xf32> to vector<8xf32>
      %336 = vector.shape_cast %335 : vector<8xf32> to vector<8x1xf32>
      %337 = math.sqrt %336 : vector<8x1xf32>
      %338 = arith.divf %337, %333 : vector<8x1xf32>
      %cst_78 = arith.constant 1.000000e-15 : f32
      %339 = vector.broadcast %cst_78 : f32 to vector<8x1xf32>
      %340 = arith.maximumf %338, %339 : vector<8x1xf32>
      %341 = vector.broadcast %4 : f32 to vector<8x1xf32>
      %342 = arith.cmpf ogt, %340, %341 : vector<8x1xf32>
      %343 = vector.broadcast %4 : f32 to vector<8x1xf32>
      %344 = arith.divf %343, %340 : vector<8x1xf32>
      %cst_79 = arith.constant 1.000000e+00 : f32
      %345 = vector.broadcast %cst_79 : f32 to vector<8x1xf32>
      %346 = arith.select %342, %344, %345 : vector<8x1xi1>, vector<8x1xf32>
      %347 = arith.divf %346, %333 : vector<8x1xf32>
      %348 = vector.broadcast %347 : vector<8x1xf32> to vector<8x128xf32>
      %349 = arith.mulf %320, %348 : vector<8x128xf32>
      %350 = vector.broadcast %4 : f32 to vector<8x1xf32>
      %351 = arith.minimumf %340, %350 : vector<8x1xf32>
      %352 = arith.mulf %351, %351 : vector<8x1xf32>
      %353 = math.sqrt %352 : vector<8x1xf32>
      %cst_80 = arith.constant 1.000000e-15 : f32
      %354 = vector.broadcast %cst_80 : f32 to vector<8x1xf32>
      %355 = arith.maximumf %353, %354 : vector<8x1xf32>
      %356 = vector.broadcast %3 : f32 to vector<8x1xf32>
      %357 = arith.mulf %356, %355 : vector<8x1xf32>
      %cst_81 = arith.constant -0.99999988 : f32
      %cst_82 = arith.constant 0.99999988 : f32
      %358 = vector.broadcast %cst_81 : f32 to vector<8x1xf32>
      %359 = arith.maximumf %358, %357 : vector<8x1xf32>
      %360 = vector.broadcast %cst_82 : f32 to vector<8x1xf32>
      %361 = arith.minimumf %360, %359 : vector<8x1xf32>
      %362 = math.log1p %361 : vector<8x1xf32>
      %cst_83 = arith.constant 0.000000e+00 : f32
      %363 = vector.broadcast %cst_83 : f32 to vector<8x1xf32>
      %364 = arith.subf %363, %361 : vector<8x1xf32>
      %365 = math.log1p %364 : vector<8x1xf32>
      %366 = arith.subf %362, %365 : vector<8x1xf32>
      %cst_84 = arith.constant 5.000000e-01 : f32
      %367 = vector.broadcast %cst_84 : f32 to vector<8x1xf32>
      %368 = arith.mulf %367, %366 : vector<8x1xf32>
      %369 = vector.broadcast %3 : f32 to vector<8x1xf32>
      %370 = arith.mulf %355, %369 : vector<8x1xf32>
      %371 = arith.divf %368, %370 : vector<8x1xf32>
      %372 = vector.broadcast %371 : vector<8x1xf32> to vector<8x128xf32>
      %373 = arith.mulf %349, %372 : vector<8x128xf32>
      %374 = arith.negf %373 : vector<8x128xf32>
      %375 = math.exp %374 : vector<8x128xf32>
      %cst_85 = arith.constant 1.000000e+00 : f32
      %376 = vector.broadcast %cst_85 : f32 to vector<8x128xf32>
      %377 = arith.addf %376, %375 : vector<8x128xf32>
      %378 = arith.divf %376, %377 : vector<8x128xf32>
      %379 = vector.broadcast %22 : vector<1x128xf32> to vector<8x128xf32>
      %380 = arith.mulf %243, %379 : vector<8x128xf32>
      %381 = vector.broadcast %22 : vector<1x128xf32> to vector<8x128xf32>
      %382 = arith.mulf %378, %381 : vector<8x128xf32>
      %383 = arith.mulf %382, %382 : vector<8x128xf32>
      %cst_86 = arith.constant dense<0.000000e+00> : vector<8xf32>
      %384 = vector.multi_reduction <add>, %383, %cst_86 [1] : vector<8x128xf32> to vector<8xf32>
      %385 = vector.shape_cast %384 : vector<8xf32> to vector<8x1xf32>
      %386 = math.sqrt %385 : vector<8x1xf32>
      %cst_87 = arith.constant 1.000000e-15 : f32
      %387 = vector.broadcast %cst_87 : f32 to vector<8x1xf32>
      %388 = arith.maximumf %386, %387 : vector<8x1xf32>
      %389 = vector.broadcast %3 : f32 to vector<8x1xf32>
      %390 = arith.mulf %389, %388 : vector<8x1xf32>
      %cst_88 = arith.constant -0.99999988 : f32
      %cst_89 = arith.constant 0.99999988 : f32
      %391 = vector.broadcast %cst_88 : f32 to vector<8x1xf32>
      %392 = arith.maximumf %391, %390 : vector<8x1xf32>
      %393 = vector.broadcast %cst_89 : f32 to vector<8x1xf32>
      %394 = arith.minimumf %393, %392 : vector<8x1xf32>
      %395 = math.log1p %394 : vector<8x1xf32>
      %cst_90 = arith.constant 0.000000e+00 : f32
      %396 = vector.broadcast %cst_90 : f32 to vector<8x1xf32>
      %397 = arith.subf %396, %394 : vector<8x1xf32>
      %398 = math.log1p %397 : vector<8x1xf32>
      %399 = arith.subf %395, %398 : vector<8x1xf32>
      %cst_91 = arith.constant 5.000000e-01 : f32
      %400 = vector.broadcast %cst_91 : f32 to vector<8x1xf32>
      %401 = arith.mulf %400, %399 : vector<8x1xf32>
      %402 = arith.divf %401, %388 : vector<8x1xf32>
      %403 = arith.mulf %arg9, %382 : vector<8x128xf32>
      %404 = arith.mulf %403, %403 : vector<8x128xf32>
      %cst_92 = arith.constant dense<0.000000e+00> : vector<8xf32>
      %405 = vector.multi_reduction <add>, %404, %cst_92 [1] : vector<8x128xf32> to vector<8xf32>
      %406 = vector.shape_cast %405 : vector<8xf32> to vector<8x1xf32>
      %407 = math.sqrt %406 : vector<8x1xf32>
      %cst_93 = arith.constant 1.000000e-15 : f32
      %408 = vector.broadcast %cst_93 : f32 to vector<8x1xf32>
      %409 = arith.maximumf %407, %408 : vector<8x1xf32>
      %410 = arith.mulf %409, %402 : vector<8x1xf32>
      %411 = math.tanh %410 : vector<8x1xf32>
      %412 = vector.broadcast %3 : f32 to vector<8x1xf32>
      %413 = arith.mulf %409, %412 : vector<8x1xf32>
      %414 = arith.divf %411, %413 : vector<8x1xf32>
      %415 = arith.mulf %407, %414 : vector<8x1xf32>
      %cst_94 = arith.constant 1.000000e-15 : f32
      %416 = vector.broadcast %cst_94 : f32 to vector<8x1xf32>
      %417 = arith.maximumf %415, %416 : vector<8x1xf32>
      %418 = vector.broadcast %4 : f32 to vector<8x1xf32>
      %419 = arith.cmpf ogt, %417, %418 : vector<8x1xf32>
      %420 = vector.broadcast %4 : f32 to vector<8x1xf32>
      %421 = arith.divf %420, %417 : vector<8x1xf32>
      %cst_95 = arith.constant 1.000000e+00 : f32
      %422 = vector.broadcast %cst_95 : f32 to vector<8x1xf32>
      %423 = arith.select %419, %421, %422 : vector<8x1xi1>, vector<8x1xf32>
      %424 = arith.mulf %414, %423 : vector<8x1xf32>
      %425 = vector.broadcast %424 : vector<8x1xf32> to vector<8x128xf32>
      %426 = arith.mulf %403, %425 : vector<8x128xf32>
      %427 = vector.broadcast %4 : f32 to vector<8x1xf32>
      %428 = arith.minimumf %417, %427 : vector<8x1xf32>
      %429 = arith.mulf %428, %428 : vector<8x1xf32>
      %430 = math.sqrt %429 : vector<8x1xf32>
      %cst_96 = arith.constant 1.000000e-15 : f32
      %431 = vector.broadcast %cst_96 : f32 to vector<8x1xf32>
      %432 = arith.maximumf %430, %431 : vector<8x1xf32>
      %433 = vector.broadcast %3 : f32 to vector<8x1xf32>
      %434 = arith.mulf %433, %432 : vector<8x1xf32>
      %cst_97 = arith.constant -0.99999988 : f32
      %cst_98 = arith.constant 0.99999988 : f32
      %435 = vector.broadcast %cst_97 : f32 to vector<8x1xf32>
      %436 = arith.maximumf %435, %434 : vector<8x1xf32>
      %437 = vector.broadcast %cst_98 : f32 to vector<8x1xf32>
      %438 = arith.minimumf %437, %436 : vector<8x1xf32>
      %439 = math.log1p %438 : vector<8x1xf32>
      %cst_99 = arith.constant 0.000000e+00 : f32
      %440 = vector.broadcast %cst_99 : f32 to vector<8x1xf32>
      %441 = arith.subf %440, %438 : vector<8x1xf32>
      %442 = math.log1p %441 : vector<8x1xf32>
      %443 = arith.subf %439, %442 : vector<8x1xf32>
      %cst_100 = arith.constant 5.000000e-01 : f32
      %444 = vector.broadcast %cst_100 : f32 to vector<8x1xf32>
      %445 = arith.mulf %444, %443 : vector<8x1xf32>
      %446 = arith.divf %445, %432 : vector<8x1xf32>
      %c0_101 = arith.constant 0 : index
      %c0_102 = arith.constant 0 : index
      %447 = vector.load %arg4[%c0_101, %c0_102] : memref<128x128xf32, #tpu.memory_space<vmem>>, vector<128x128xf32>
      %cst_103 = arith.constant dense<0.000000e+00> : vector<8x128xf32>
      %448 = tpu.matmul %426, %447, %cst_103 {dimension_numbers = #tpu.dot_dimension_numbers<[1], [0], [0], [1], [0, 0, 1, 1], [], []>} : vector<8x128xf32>, vector<128x128xf32>, vector<8x128xf32> -> vector<8x128xf32>
      %449 = arith.mulf %448, %448 : vector<8x128xf32>
      %cst_104 = arith.constant dense<0.000000e+00> : vector<8xf32>
      %450 = vector.multi_reduction <add>, %449, %cst_104 [1] : vector<8x128xf32> to vector<8xf32>
      %451 = vector.shape_cast %450 : vector<8xf32> to vector<8x1xf32>
      %452 = math.sqrt %451 : vector<8x1xf32>
      %cst_105 = arith.constant 1.000000e-15 : f32
      %453 = vector.broadcast %cst_105 : f32 to vector<8x1xf32>
      %454 = arith.maximumf %452, %453 : vector<8x1xf32>
      %455 = arith.mulf %454, %446 : vector<8x1xf32>
      %456 = math.tanh %455 : vector<8x1xf32>
      %457 = vector.broadcast %3 : f32 to vector<8x1xf32>
      %458 = arith.mulf %454, %457 : vector<8x1xf32>
      %459 = arith.divf %456, %458 : vector<8x1xf32>
      %460 = arith.mulf %452, %459 : vector<8x1xf32>
      %cst_106 = arith.constant 1.000000e-15 : f32
      %461 = vector.broadcast %cst_106 : f32 to vector<8x1xf32>
      %462 = arith.maximumf %460, %461 : vector<8x1xf32>
      %463 = vector.broadcast %4 : f32 to vector<8x1xf32>
      %464 = arith.cmpf ogt, %462, %463 : vector<8x1xf32>
      %465 = vector.broadcast %4 : f32 to vector<8x1xf32>
      %466 = arith.divf %465, %462 : vector<8x1xf32>
      %cst_107 = arith.constant 1.000000e+00 : f32
      %467 = vector.broadcast %cst_107 : f32 to vector<8x1xf32>
      %468 = arith.select %464, %466, %467 : vector<8x1xi1>, vector<8x1xf32>
      %469 = arith.mulf %459, %468 : vector<8x1xf32>
      %470 = vector.broadcast %469 : vector<8x1xf32> to vector<8x128xf32>
      %471 = arith.mulf %448, %470 : vector<8x128xf32>
      %472 = vector.broadcast %4 : f32 to vector<8x1xf32>
      %473 = arith.minimumf %462, %472 : vector<8x1xf32>
      %474 = arith.mulf %473, %473 : vector<8x1xf32>
      %475 = arith.mulf %35, %35 : vector<8x128xf32>
      %cst_108 = arith.constant dense<0.000000e+00> : vector<8xf32>
      %476 = vector.multi_reduction <add>, %475, %cst_108 [1] : vector<8x128xf32> to vector<8xf32>
      %477 = vector.shape_cast %476 : vector<8xf32> to vector<8x1xf32>
      %478 = arith.mulf %471, %35 : vector<8x128xf32>
      %cst_109 = arith.constant dense<0.000000e+00> : vector<8xf32>
      %479 = vector.multi_reduction <add>, %478, %cst_109 [1] : vector<8x128xf32> to vector<8xf32>
      %480 = vector.shape_cast %479 : vector<8xf32> to vector<8x1xf32>
      %cst_110 = arith.constant 2.000000e+00 : f32
      %481 = arith.mulf %cst_110, %cst_9 : f32
      %482 = vector.broadcast %481 : f32 to vector<8x1xf32>
      %483 = arith.mulf %482, %480 : vector<8x1xf32>
      %cst_111 = arith.constant 1.000000e+00 : f32
      %484 = vector.broadcast %cst_111 : f32 to vector<8x1xf32>
      %485 = arith.addf %484, %483 : vector<8x1xf32>
      %486 = vector.broadcast %cst_9 : f32 to vector<8x1xf32>
      %487 = arith.mulf %486, %477 : vector<8x1xf32>
      %488 = arith.addf %485, %487 : vector<8x1xf32>
      %489 = vector.broadcast %cst_9 : f32 to vector<8x1xf32>
      %490 = arith.mulf %489, %474 : vector<8x1xf32>
      %cst_112 = arith.constant 1.000000e+00 : f32
      %491 = vector.broadcast %cst_112 : f32 to vector<8x1xf32>
      %492 = arith.subf %491, %490 : vector<8x1xf32>
      %493 = vector.broadcast %488 : vector<8x1xf32> to vector<8x128xf32>
      %494 = arith.mulf %493, %471 : vector<8x128xf32>
      %495 = vector.broadcast %492 : vector<8x1xf32> to vector<8x128xf32>
      %496 = arith.mulf %495, %35 : vector<8x128xf32>
      %497 = arith.addf %494, %496 : vector<8x128xf32>
      %cst_113 = arith.constant 2.000000e+00 : f32
      %498 = arith.mulf %cst_113, %cst_9 : f32
      %499 = vector.broadcast %498 : f32 to vector<8x1xf32>
      %500 = arith.mulf %499, %480 : vector<8x1xf32>
      %cst_114 = arith.constant 1.000000e+00 : f32
      %501 = vector.broadcast %cst_114 : f32 to vector<8x1xf32>
      %502 = arith.addf %501, %500 : vector<8x1xf32>
      %503 = arith.mulf %cst_9, %cst_9 : f32
      %504 = vector.broadcast %503 : f32 to vector<8x1xf32>
      %505 = arith.mulf %504, %474 : vector<8x1xf32>
      %506 = arith.mulf %505, %477 : vector<8x1xf32>
      %507 = arith.addf %502, %506 : vector<8x1xf32>
      %cst_115 = arith.constant 1.000000e-15 : f32
      %508 = vector.broadcast %cst_115 : f32 to vector<8x1xf32>
      %509 = arith.maximumf %507, %508 : vector<8x1xf32>
      %510 = arith.mulf %497, %497 : vector<8x128xf32>
      %cst_116 = arith.constant dense<0.000000e+00> : vector<8xf32>
      %511 = vector.multi_reduction <add>, %510, %cst_116 [1] : vector<8x128xf32> to vector<8xf32>
      %512 = vector.shape_cast %511 : vector<8xf32> to vector<8x1xf32>
      %513 = math.sqrt %512 : vector<8x1xf32>
      %514 = arith.divf %513, %509 : vector<8x1xf32>
      %cst_117 = arith.constant 1.000000e-15 : f32
      %515 = vector.broadcast %cst_117 : f32 to vector<8x1xf32>
      %516 = arith.maximumf %514, %515 : vector<8x1xf32>
      %517 = vector.broadcast %4 : f32 to vector<8x1xf32>
      %518 = arith.cmpf ogt, %516, %517 : vector<8x1xf32>
      %519 = vector.broadcast %4 : f32 to vector<8x1xf32>
      %520 = arith.divf %519, %516 : vector<8x1xf32>
      %cst_118 = arith.constant 1.000000e+00 : f32
      %521 = vector.broadcast %cst_118 : f32 to vector<8x1xf32>
      %522 = arith.select %518, %520, %521 : vector<8x1xi1>, vector<8x1xf32>
      %523 = arith.divf %522, %509 : vector<8x1xf32>
      %524 = vector.broadcast %523 : vector<8x1xf32> to vector<8x128xf32>
      %525 = arith.mulf %497, %524 : vector<8x128xf32>
      %526 = vector.broadcast %4 : f32 to vector<8x1xf32>
      %527 = arith.minimumf %516, %526 : vector<8x1xf32>
      %528 = arith.mulf %527, %527 : vector<8x1xf32>
      %529 = vector.broadcast %8 : vector<1x128xf32> to vector<8x128xf32>
      %530 = arith.mulf %525, %529 : vector<8x128xf32>
      %cst_119 = arith.constant dense<0.000000e+00> : vector<8xf32>
      %531 = vector.multi_reduction <add>, %530, %cst_119 [1] : vector<8x128xf32> to vector<8xf32>
      %532 = vector.shape_cast %531 : vector<8xf32> to vector<8x1xf32>
      %cst_120 = arith.constant 2.000000e+00 : f32
      %533 = arith.mulf %cst_120, %cst_9 : f32
      %534 = vector.broadcast %533 : f32 to vector<8x1xf32>
      %535 = arith.mulf %534, %532 : vector<8x1xf32>
      %cst_121 = arith.constant 1.000000e+00 : f32
      %536 = vector.broadcast %cst_121 : f32 to vector<8x1xf32>
      %537 = arith.addf %536, %535 : vector<8x1xf32>
      %538 = vector.broadcast %cst_9 : f32 to vector<1x1xf32>
      %539 = arith.mulf %538, %17 : vector<1x1xf32>
      %540 = vector.broadcast %539 : vector<1x1xf32> to vector<8x1xf32>
      %541 = arith.addf %537, %540 : vector<8x1xf32>
      %542 = vector.broadcast %cst_9 : f32 to vector<8x1xf32>
      %543 = arith.mulf %542, %528 : vector<8x1xf32>
      %cst_122 = arith.constant 1.000000e+00 : f32
      %544 = vector.broadcast %cst_122 : f32 to vector<8x1xf32>
      %545 = arith.subf %544, %543 : vector<8x1xf32>
      %546 = vector.broadcast %541 : vector<8x1xf32> to vector<8x128xf32>
      %547 = arith.mulf %546, %525 : vector<8x128xf32>
      %548 = vector.broadcast %545 : vector<8x1xf32> to vector<8x128xf32>
      %549 = vector.broadcast %8 : vector<1x128xf32> to vector<8x128xf32>
      %550 = arith.mulf %548, %549 : vector<8x128xf32>
      %551 = arith.addf %547, %550 : vector<8x128xf32>
      %cst_123 = arith.constant 2.000000e+00 : f32
      %552 = arith.mulf %cst_123, %cst_9 : f32
      %553 = vector.broadcast %552 : f32 to vector<8x1xf32>
      %554 = arith.mulf %553, %532 : vector<8x1xf32>
      %cst_124 = arith.constant 1.000000e+00 : f32
      %555 = vector.broadcast %cst_124 : f32 to vector<8x1xf32>
      %556 = arith.addf %555, %554 : vector<8x1xf32>
      %557 = arith.mulf %cst_9, %cst_9 : f32
      %558 = vector.broadcast %557 : f32 to vector<8x1xf32>
      %559 = arith.mulf %558, %528 : vector<8x1xf32>
      %560 = vector.broadcast %17 : vector<1x1xf32> to vector<8x1xf32>
      %561 = arith.mulf %559, %560 : vector<8x1xf32>
      %562 = arith.addf %556, %561 : vector<8x1xf32>
      %cst_125 = arith.constant 1.000000e-15 : f32
      %563 = vector.broadcast %cst_125 : f32 to vector<8x1xf32>
      %564 = arith.maximumf %562, %563 : vector<8x1xf32>
      %565 = arith.mulf %551, %551 : vector<8x128xf32>
      %cst_126 = arith.constant dense<0.000000e+00> : vector<8xf32>
      %566 = vector.multi_reduction <add>, %565, %cst_126 [1] : vector<8x128xf32> to vector<8xf32>
      %567 = vector.shape_cast %566 : vector<8xf32> to vector<8x1xf32>
      %568 = math.sqrt %567 : vector<8x1xf32>
      %569 = arith.divf %568, %564 : vector<8x1xf32>
      %cst_127 = arith.constant 1.000000e-15 : f32
      %570 = vector.broadcast %cst_127 : f32 to vector<8x1xf32>
      %571 = arith.maximumf %569, %570 : vector<8x1xf32>
      %572 = vector.broadcast %4 : f32 to vector<8x1xf32>
      %573 = arith.cmpf ogt, %571, %572 : vector<8x1xf32>
      %574 = vector.broadcast %4 : f32 to vector<8x1xf32>
      %575 = arith.divf %574, %571 : vector<8x1xf32>
      %cst_128 = arith.constant 1.000000e+00 : f32
      %576 = vector.broadcast %cst_128 : f32 to vector<8x1xf32>
      %577 = arith.select %573, %575, %576 : vector<8x1xi1>, vector<8x1xf32>
      %578 = arith.divf %577, %564 : vector<8x1xf32>
      %579 = vector.broadcast %578 : vector<8x1xf32> to vector<8x128xf32>
      %580 = arith.mulf %551, %579 : vector<8x128xf32>
      %581 = vector.broadcast %4 : f32 to vector<8x1xf32>
      %582 = arith.minimumf %571, %581 : vector<8x1xf32>
      %583 = arith.mulf %582, %582 : vector<8x1xf32>
      %cst_129 = arith.constant 0.000000e+00 : f32
      %584 = vector.broadcast %cst_129 : f32 to vector<8x128xf32>
      %585 = arith.subf %584, %arg9 : vector<8x128xf32>
      %586 = arith.mulf %585, %580 : vector<8x128xf32>
      %cst_130 = arith.constant dense<0.000000e+00> : vector<8xf32>
      %587 = vector.multi_reduction <add>, %586, %cst_130 [1] : vector<8x128xf32> to vector<8xf32>
      %588 = vector.shape_cast %587 : vector<8xf32> to vector<8x1xf32>
      %cst_131 = arith.constant 2.000000e+00 : f32
      %589 = arith.mulf %cst_131, %cst_9 : f32
      %590 = vector.broadcast %589 : f32 to vector<8x1xf32>
      %591 = arith.mulf %590, %588 : vector<8x1xf32>
      %cst_132 = arith.constant 1.000000e+00 : f32
      %592 = vector.broadcast %cst_132 : f32 to vector<8x1xf32>
      %593 = arith.addf %592, %591 : vector<8x1xf32>
      %594 = vector.broadcast %cst_9 : f32 to vector<8x1xf32>
      %595 = arith.mulf %594, %583 : vector<8x1xf32>
      %596 = arith.addf %593, %595 : vector<8x1xf32>
      %597 = vector.broadcast %cst_9 : f32 to vector<8x1xf32>
      %598 = arith.mulf %597, %arg10 : vector<8x1xf32>
      %cst_133 = arith.constant 1.000000e+00 : f32
      %599 = vector.broadcast %cst_133 : f32 to vector<8x1xf32>
      %600 = arith.subf %599, %598 : vector<8x1xf32>
      %601 = vector.broadcast %596 : vector<8x1xf32> to vector<8x128xf32>
      %602 = arith.mulf %601, %585 : vector<8x128xf32>
      %603 = vector.broadcast %600 : vector<8x1xf32> to vector<8x128xf32>
      %604 = arith.mulf %603, %580 : vector<8x128xf32>
      %605 = arith.addf %602, %604 : vector<8x128xf32>
      %cst_134 = arith.constant 2.000000e+00 : f32
      %606 = arith.mulf %cst_134, %cst_9 : f32
      %607 = vector.broadcast %606 : f32 to vector<8x1xf32>
      %608 = arith.mulf %607, %588 : vector<8x1xf32>
      %cst_135 = arith.constant 1.000000e+00 : f32
      %609 = vector.broadcast %cst_135 : f32 to vector<8x1xf32>
      %610 = arith.addf %609, %608 : vector<8x1xf32>
      %611 = arith.mulf %cst_9, %cst_9 : f32
      %612 = vector.broadcast %611 : f32 to vector<8x1xf32>
      %613 = arith.mulf %612, %arg10 : vector<8x1xf32>
      %614 = arith.mulf %613, %583 : vector<8x1xf32>
      %615 = arith.addf %610, %614 : vector<8x1xf32>
      %cst_136 = arith.constant 1.000000e-15 : f32
      %616 = vector.broadcast %cst_136 : f32 to vector<8x1xf32>
      %617 = arith.maximumf %615, %616 : vector<8x1xf32>
      %618 = arith.mulf %605, %605 : vector<8x128xf32>
      %cst_137 = arith.constant dense<0.000000e+00> : vector<8xf32>
      %619 = vector.multi_reduction <add>, %618, %cst_137 [1] : vector<8x128xf32> to vector<8xf32>
      %620 = vector.shape_cast %619 : vector<8xf32> to vector<8x1xf32>
      %621 = math.sqrt %620 : vector<8x1xf32>
      %622 = arith.divf %621, %617 : vector<8x1xf32>
      %cst_138 = arith.constant 1.000000e-15 : f32
      %623 = vector.broadcast %cst_138 : f32 to vector<8x1xf32>
      %624 = arith.maximumf %622, %623 : vector<8x1xf32>
      %625 = vector.broadcast %4 : f32 to vector<8x1xf32>
      %626 = arith.cmpf ogt, %624, %625 : vector<8x1xf32>
      %627 = vector.broadcast %4 : f32 to vector<8x1xf32>
      %628 = arith.divf %627, %624 : vector<8x1xf32>
      %cst_139 = arith.constant 1.000000e+00 : f32
      %629 = vector.broadcast %cst_139 : f32 to vector<8x1xf32>
      %630 = arith.select %626, %628, %629 : vector<8x1xi1>, vector<8x1xf32>
      %631 = arith.divf %630, %617 : vector<8x1xf32>
      %632 = vector.broadcast %631 : vector<8x1xf32> to vector<8x128xf32>
      %633 = arith.mulf %605, %632 : vector<8x128xf32>
      %634 = arith.mulf %380, %380 : vector<8x128xf32>
      %cst_140 = arith.constant dense<0.000000e+00> : vector<8xf32>
      %635 = vector.multi_reduction <add>, %634, %cst_140 [1] : vector<8x128xf32> to vector<8xf32>
      %636 = vector.shape_cast %635 : vector<8xf32> to vector<8x1xf32>
      %637 = math.sqrt %636 : vector<8x1xf32>
      %cst_141 = arith.constant 1.000000e-15 : f32
      %638 = vector.broadcast %cst_141 : f32 to vector<8x1xf32>
      %639 = arith.maximumf %637, %638 : vector<8x1xf32>
      %640 = vector.broadcast %3 : f32 to vector<8x1xf32>
      %641 = arith.mulf %640, %639 : vector<8x1xf32>
      %cst_142 = arith.constant -0.99999988 : f32
      %cst_143 = arith.constant 0.99999988 : f32
      %642 = vector.broadcast %cst_142 : f32 to vector<8x1xf32>
      %643 = arith.maximumf %642, %641 : vector<8x1xf32>
      %644 = vector.broadcast %cst_143 : f32 to vector<8x1xf32>
      %645 = arith.minimumf %644, %643 : vector<8x1xf32>
      %646 = math.log1p %645 : vector<8x1xf32>
      %cst_144 = arith.constant 0.000000e+00 : f32
      %647 = vector.broadcast %cst_144 : f32 to vector<8x1xf32>
      %648 = arith.subf %647, %645 : vector<8x1xf32>
      %649 = math.log1p %648 : vector<8x1xf32>
      %650 = arith.subf %646, %649 : vector<8x1xf32>
      %cst_145 = arith.constant 5.000000e-01 : f32
      %651 = vector.broadcast %cst_145 : f32 to vector<8x1xf32>
      %652 = arith.mulf %651, %650 : vector<8x1xf32>
      %653 = arith.divf %652, %639 : vector<8x1xf32>
      %654 = arith.mulf %633, %380 : vector<8x128xf32>
      %655 = arith.mulf %654, %654 : vector<8x128xf32>
      %cst_146 = arith.constant dense<0.000000e+00> : vector<8xf32>
      %656 = vector.multi_reduction <add>, %655, %cst_146 [1] : vector<8x128xf32> to vector<8xf32>
      %657 = vector.shape_cast %656 : vector<8xf32> to vector<8x1xf32>
      %658 = math.sqrt %657 : vector<8x1xf32>
      %cst_147 = arith.constant 1.000000e-15 : f32
      %659 = vector.broadcast %cst_147 : f32 to vector<8x1xf32>
      %660 = arith.maximumf %658, %659 : vector<8x1xf32>
      %661 = arith.mulf %660, %653 : vector<8x1xf32>
      %662 = math.tanh %661 : vector<8x1xf32>
      %663 = vector.broadcast %3 : f32 to vector<8x1xf32>
      %664 = arith.mulf %660, %663 : vector<8x1xf32>
      %665 = arith.divf %662, %664 : vector<8x1xf32>
      %666 = arith.mulf %658, %665 : vector<8x1xf32>
      %cst_148 = arith.constant 1.000000e-15 : f32
      %667 = vector.broadcast %cst_148 : f32 to vector<8x1xf32>
      %668 = arith.maximumf %666, %667 : vector<8x1xf32>
      %669 = vector.broadcast %4 : f32 to vector<8x1xf32>
      %670 = arith.cmpf ogt, %668, %669 : vector<8x1xf32>
      %671 = vector.broadcast %4 : f32 to vector<8x1xf32>
      %672 = arith.divf %671, %668 : vector<8x1xf32>
      %cst_149 = arith.constant 1.000000e+00 : f32
      %673 = vector.broadcast %cst_149 : f32 to vector<8x1xf32>
      %674 = arith.select %670, %672, %673 : vector<8x1xi1>, vector<8x1xf32>
      %675 = arith.mulf %665, %674 : vector<8x1xf32>
      %676 = vector.broadcast %675 : vector<8x1xf32> to vector<8x128xf32>
      %677 = arith.mulf %654, %676 : vector<8x128xf32>
      %678 = vector.broadcast %4 : f32 to vector<8x1xf32>
      %679 = arith.minimumf %668, %678 : vector<8x1xf32>
      %680 = arith.mulf %679, %679 : vector<8x1xf32>
      %681 = arith.mulf %arg9, %677 : vector<8x128xf32>
      %cst_150 = arith.constant dense<0.000000e+00> : vector<8xf32>
      %682 = vector.multi_reduction <add>, %681, %cst_150 [1] : vector<8x128xf32> to vector<8xf32>
      %683 = vector.shape_cast %682 : vector<8xf32> to vector<8x1xf32>
      %cst_151 = arith.constant 2.000000e+00 : f32
      %684 = arith.mulf %cst_151, %cst_9 : f32
      %685 = vector.broadcast %684 : f32 to vector<8x1xf32>
      %686 = arith.mulf %685, %683 : vector<8x1xf32>
      %cst_152 = arith.constant 1.000000e+00 : f32
      %687 = vector.broadcast %cst_152 : f32 to vector<8x1xf32>
      %688 = arith.addf %687, %686 : vector<8x1xf32>
      %689 = vector.broadcast %cst_9 : f32 to vector<8x1xf32>
      %690 = arith.mulf %689, %680 : vector<8x1xf32>
      %691 = arith.addf %688, %690 : vector<8x1xf32>
      %692 = vector.broadcast %cst_9 : f32 to vector<8x1xf32>
      %693 = arith.mulf %692, %arg10 : vector<8x1xf32>
      %cst_153 = arith.constant 1.000000e+00 : f32
      %694 = vector.broadcast %cst_153 : f32 to vector<8x1xf32>
      %695 = arith.subf %694, %693 : vector<8x1xf32>
      %696 = vector.broadcast %691 : vector<8x1xf32> to vector<8x128xf32>
      %697 = arith.mulf %696, %arg9 : vector<8x128xf32>
      %698 = vector.broadcast %695 : vector<8x1xf32> to vector<8x128xf32>
      %699 = arith.mulf %698, %677 : vector<8x128xf32>
      %700 = arith.addf %697, %699 : vector<8x128xf32>
      %cst_154 = arith.constant 2.000000e+00 : f32
      %701 = arith.mulf %cst_154, %cst_9 : f32
      %702 = vector.broadcast %701 : f32 to vector<8x1xf32>
      %703 = arith.mulf %702, %683 : vector<8x1xf32>
      %cst_155 = arith.constant 1.000000e+00 : f32
      %704 = vector.broadcast %cst_155 : f32 to vector<8x1xf32>
      %705 = arith.addf %704, %703 : vector<8x1xf32>
      %706 = arith.mulf %cst_9, %cst_9 : f32
      %707 = vector.broadcast %706 : f32 to vector<8x1xf32>
      %708 = arith.mulf %707, %arg10 : vector<8x1xf32>
      %709 = arith.mulf %708, %680 : vector<8x1xf32>
      %710 = arith.addf %705, %709 : vector<8x1xf32>
      %cst_156 = arith.constant 1.000000e-15 : f32
      %711 = vector.broadcast %cst_156 : f32 to vector<8x1xf32>
      %712 = arith.maximumf %710, %711 : vector<8x1xf32>
      %713 = arith.mulf %700, %700 : vector<8x128xf32>
      %cst_157 = arith.constant dense<0.000000e+00> : vector<8xf32>
      %714 = vector.multi_reduction <add>, %713, %cst_157 [1] : vector<8x128xf32> to vector<8xf32>
      %715 = vector.shape_cast %714 : vector<8xf32> to vector<8x1xf32>
      %716 = math.sqrt %715 : vector<8x1xf32>
      %717 = arith.divf %716, %712 : vector<8x1xf32>
      %cst_158 = arith.constant 1.000000e-15 : f32
      %718 = vector.broadcast %cst_158 : f32 to vector<8x1xf32>
      %719 = arith.maximumf %717, %718 : vector<8x1xf32>
      %720 = vector.broadcast %4 : f32 to vector<8x1xf32>
      %721 = arith.cmpf ogt, %719, %720 : vector<8x1xf32>
      %722 = vector.broadcast %4 : f32 to vector<8x1xf32>
      %723 = arith.divf %722, %719 : vector<8x1xf32>
      %cst_159 = arith.constant 1.000000e+00 : f32
      %724 = vector.broadcast %cst_159 : f32 to vector<8x1xf32>
      %725 = arith.select %721, %723, %724 : vector<8x1xi1>, vector<8x1xf32>
      %726 = arith.divf %725, %712 : vector<8x1xf32>
      %727 = vector.broadcast %726 : vector<8x1xf32> to vector<8x128xf32>
      %728 = arith.mulf %700, %727 : vector<8x128xf32>
      %729 = vector.broadcast %4 : f32 to vector<8x1xf32>
      %730 = arith.minimumf %719, %729 : vector<8x1xf32>
      %731 = arith.mulf %730, %730 : vector<8x1xf32>
      %732 = arith.index_cast %arg8 : i32 to index
      %c0_160 = arith.constant 0 : index
      %c0_161 = arith.constant 0 : index
      %733 = vector.load %arg6[%732, %c0_160, %c0_161] : memref<8x8x128xf32, #tpu.memory_space<vmem>>, vector<1x8x128xf32>
      %734 = vector.shape_cast %733 : vector<1x8x128xf32> to vector<8x128xf32>
      %735 = vector.shape_cast %728 : vector<8x128xf32> to vector<1x8x128xf32>
      tpu.vector_store %arg6[%732, %c0_160, %c0_161], %735 {strides = array<i32>} : memref<8x8x128xf32, #tpu.memory_space<vmem>>, vector<1x8x128xf32>,
      scf.yield %728, %731 : vector<8x128xf32>, vector<8x1xf32>
    }
    %c8_i32_11 = arith.constant 8 : i32
    %c0_12 = arith.constant 0 : index
    %c0_13 = arith.constant 0 : index
    %29 = vector.load %arg7[%c0_12, %c0_13] : memref<8x128xf32, #tpu.memory_space<vmem>>, vector<8x128xf32>
    tpu.vector_store %arg7[%c0_12, %c0_13], %28#0 {strides = array<i32>} : memref<8x128xf32, #tpu.memory_space<vmem>>, vector<8x128xf32>,
    return
  }
  func.func @transform_0(%arg0: i32, %arg1: i32) -> (i32, i32, i32) {
    %c0_i32 = arith.constant 0 : i32
    %c0_i32_0 = arith.constant 0 : i32
    return %arg1, %arg0, %c0_i32 : i32, i32, i32
  }
  func.func @transform_1(%arg0: i32, %arg1: i32) -> (i32, i32) {
    %c0_i32 = arith.constant 0 : i32
    %c0_i32_0 = arith.constant 0 : i32
    %c0_i32_1 = arith.constant 0 : i32
    return %c0_i32, %c0_i32_0 : i32, i32
  }
  func.func @transform_2(%arg0: i32, %arg1: i32) -> (i32, i32) {
    %c0_i32 = arith.constant 0 : i32
    %c0_i32_0 = arith.constant 0 : i32
    %c0_i32_1 = arith.constant 0 : i32
    return %c0_i32, %c0_i32_0 : i32, i32
  }
  func.func @transform_3(%arg0: i32, %arg1: i32) -> (i32, i32) {
    %c0_i32 = arith.constant 0 : i32
    %c0_i32_0 = arith.constant 0 : i32
    %c0_i32_1 = arith.constant 0 : i32
    return %c0_i32, %c0_i32_0 : i32, i32
  }
  func.func @transform_4(%arg0: i32, %arg1: i32) -> (i32, i32, i32) {
    %c0_i32 = arith.constant 0 : i32
    %c0_i32_0 = arith.constant 0 : i32
    return %arg1, %arg0, %c0_i32 : i32, i32, i32
  }
}

</mosaic_0001>

<bundles_post_ra>
// kernel: tpu_custom_call.1
= control target key start
LH: loop header
LB: loop body
LE: loop exit
PB: predicated region body
PF: predicated region fallthrough
CT: control target
= control target key end

     0   :  { %9 = vsyncpa [#allocation4], 0  ;;  %s1554_s0 = inlined_call_operand.hbm [shape: f32[8,8,384], index: 0, kind: input, shape index: {}]   ;;  %s1555_s1 = inlined_call_operand.hbm [shape: f32[128,256], index: 1, kind: input, shape index: {}]   ;;  %s1556_s2 = inlined_call_operand.hbm [shape: f32[128,128], index: 2, kind: input, shape index: {}]   ;;  %s1557_s3 = inlined_call_operand.vmem [shape: f32[3,128], index: 3, kind: input, shape index: {}]   ;;  %s1558_s4 = inlined_call_operand.hbm [shape: f32[8,8,128], index: 4, kind: output, shape index: {}]  }
   0x1   :  { %10 = vsyncpa [#allocation7], 0 }
   0x2   :  { %11 = vsyncpa [#allocation5], 0  ;;  %s1332_s15 = smov [#allocation6]  }
   0x3   :  { %s29_s16 = sshll.u32 %s1332_s15, 4  ;;  %s30_s16 = int_to_ptr.vmem [resolvable:$true] %s29_s16 }
   0x4   :  { %s1230_s17 = scalar_lea.vmem %s30_s16, 4096  ;;  %p1235_p1 = scmp.lt.s32.totalorder %s30_s16, %s30_s16 }
   0x5   :  { %p1231_p0 = scmp.ne.s32.totalorder %s30_s16, %s1230_s17  ;;  %p1236_p2 = scmp.lt.s32.totalorder %s1230_s17, %s1230_s17 }
   0x7   :  { %p1237_p3 = por %p1236_p2, %p1235_p1 }
   0x9   :  { %p1238_p4 = pnand %p1237_p3, %p1231_p0 }
   0xb   :  { %1241 = shalt.err (!%p1238_p4)
}
   0xc   :  { %s1333_s18 = smov 256   ;;  %s1334_s19 = smov 16  }
   0xd   :  { %35 = dma.hbm_to_vmem [thread:$0]  %s1555_s1, 4096, %s30_s16, [#allocation7], %s1333_s18, %s1333_s18, %s1334_s19  }
   0xe   :  { %s1335_s22 = smov [#allocation3]  }
   0xf   :  { %s17_s23 = sshll.u32 %s1335_s22, 4  ;;  %s18_s23 = int_to_ptr.vmem [resolvable:$true] %s17_s23 }
  0x10   :  { %s1250_s24 = scalar_lea.vmem %s18_s23, 3072  ;;  %p1255_p6 = scmp.lt.s32.totalorder %s18_s23, %s18_s23 }
  0x11   :  { %p1251_p5 = scmp.ne.s32.totalorder %s18_s23, %s1250_s24  ;;  %p1256_p7 = scmp.lt.s32.totalorder %s1250_s24, %s1250_s24 }
  0x13   :  { %p1257_p8 = por %p1256_p7, %p1255_p6 }
  0x15   :  { %p1258_p9 = pnand %p1257_p8, %p1251_p5 }
  0x17   :  { %1261 = shalt.err (!%p1258_p9)
}
  0x18   :  { %s1336_s25 = smov 384   ;;  %s1337_s26 = smov 24  }
  0x19   :  { %23 = dma.hbm_to_vmem [thread:$0]  %s1554_s0, 3072, %s18_s23, [#allocation4], %s1336_s25, %s1336_s25, %s1337_s26  }
  0x1a   :  { %s1338_s29 = smov [#allocation8]  }
  0x1b   :  { %s41_s30 = sshll.u32 %s1338_s29, 4  ;;  %s42_s30 = int_to_ptr.vmem [resolvable:$true] %s41_s30 }
  0x1c   :  { %s1270_s1 = scalar_lea.vmem %s42_s30, 2048  ;;  %p1275_p11 = scmp.lt.s32.totalorder %s42_s30, %s42_s30 }
  0x1d   :  { %p1271_p10 = scmp.ne.s32.totalorder %s42_s30, %s1270_s1  ;;  %p1276_p12 = scmp.lt.s32.totalorder %s1270_s1, %s1270_s1 }
  0x1f   :  { %p1277_p13 = por %p1276_p12, %p1275_p11 }
  0x21   :  { %p1278_p0 = pnand %p1277_p13, %p1271_p10 }
  0x23   :  { %1281 = shalt.err (!%p1278_p0)
}
  0x24   :  { %s1339_s5 = smov 128   ;;  %s1340_s6 = smov 8  }
  0x25   :  { %47 = dma.hbm_to_vmem [thread:$0]  %s1556_s2, 2048, %s42_s30, [#allocation7], %s1339_s5, %s1339_s5, %s1340_s6  }
  0x26   :  { %1314 = dma.done.wait [#allocation4], 3072  }
  0x27   :  { %1315 = vsyncadd [#allocation4], 4294964224 }
  0x28   :  { %1316 = dma.done.wait [#allocation7], 6144  }
  0x29   :  { %1317 = vsyncadd [#allocation7], 4294961152  ;;  %v78_v0 = vlaneseq  ;;  %v1341_v2 = vmov 0.0   ;;  %v1388_v4 = vld [vmem:[%s1557_s3] sm:$0x7]  ;;  %vm74_vm1 = vcmask 1042434  }
  0x2a   :  { %vm66_vm2 = vcmask 1040384   ;;  %v65_v5 = vmul.f32 %v1388_v4, %v1388_v4  ;;  %vm70_vm3 = vcmask 1041409   ;;  %v1400_v13 = vmov 0.0   ;;  %s1402_s2 = smov 0  }
  0x2b   :  { %v79_v1 = vand.u32 127, %v78_v0 }
  0x2c   :  { %v75_v6 = vsel %vm74_vm1, %v65_v5, 0.0  ;;  %v67_v7 = vsel %vm66_vm2, %v65_v5, 0.0  ;;  %v71_v8 = vsel %vm70_vm3, %v65_v5, 0.0 }
  0x2d   :  { %vm80_vm0 = vcmp.lt.s32.totalorder %v79_v1, 32  ;;  %76 = vadd.xlane.f32.xlu1 %v75_v6  ;;  %68 = vadd.xlane.f32.xlu0 %v67_v7 }
  0x2e   :  { %v1383_v3 = vsel %vm80_vm0, 1.0, %v1341_v2 }
  0x31   :  { %72 = vadd.xlane.f32.xlu0 %v71_v8  ;;  %85 = vadd.xlane.f32.xlu1 %v1341_v2 }
  0xb6   :  { %v1392_v9 = vpop.xlane.xlu1 %76  ;;  %v1394_v10 = vpop.xlane.xlu0 %68 }
  0xba   :  { %v1396_v11 = vpop.xlane.xlu0 %72  ;;  %v86_v12 = vpop.xlane.xlu1 %85  }
  0xbb LB: > { %v165_v14 = vld [vmem:[#allocation6 + $0xf8] sm:$0xff]  ;;  %v164_v15 = vld [vmem:[#allocation6 + $0xf0] sm:$0xff]  ;;  %v163_v16 = vld [vmem:[#allocation6 + $0xe8] sm:$0xff]  ;;  %v1342_v18 = vmov 0.0   ;;  %s988_s3 = smul.u32 24, %s1330_s2  ;;  %1078 = vrsqrt.f32 %v1322_v12  ;;  %vm103_vm4 = vcmp.eq.f32.partialorder %v1322_v12, inf  ;;  %s1330_s2 = sphi %s1402_s2, %s92_s2   ;;  %v1326_v13 = vphi %v1400_v13, %v937_v13   ;;  %v1322_v12 = vphi %v86_v12, %v939_v12  }
  0xbc   : > { %166 = vmatprep.subr.mxu0 %v165_v14  ;;  %v162_v17 = vld [vmem:[#allocation6 + $0xe0] sm:$0xff]  ;;  %230 = vmatprep.mubr.f32.mxu0 %v1342_v18  ;;  %v161_v19 = vld [vmem:[#allocation6 + $0xd8] sm:$0xff]  ;;  %v160_v20 = vld [vmem:[#allocation6 + $0xd0] sm:$0xff]  ;;  %v106_v54 = vand.u32 2147483648, %v1322_v12  ;;  %vm105_vm5 = vcmp.eq.f32.partialorder %v1322_v12, 0.0  ;;  %s987_s11 = sshll.u32 %s1330_s2, 3 }
  0xbd   : > { %167 = vmatpush1.msra.mxu0 %v164_v15  ;;  %1006 = vmatprep.subr.mxu1 %v1342_v18  ;;  %v159_v21 = vld [vmem:[#allocation6 + $0xc8] sm:$0xff]  ;;  %v158_v22 = vld [vmem:[#allocation6 + $0xc0] sm:$0xff]  ;;  %v157_v23 = vld [vmem:[#allocation6 + $0xb8] sm:$0xff]  ;;  %s1417_s10 = scalar_lea.vmem [#allocation3], %s988_s3  ;;  %s941_s12 = scalar_lea.vmem [#allocation9], %s987_s11 }
  0xbe   : > { %168 = vmatprep.subr.mxu0 %v163_v16  ;;  %v156_v24 = vld [vmem:[#allocation6 + $0xb0] sm:$0xff]  ;;  %v155_v25 = vld [vmem:[#allocation6 + $0xa8] sm:$0xff]  ;;  %v154_v26 = vld [vmem:[#allocation6 + $0xa0] sm:$0xff]  ;;  %s92_s2 = sadd.s32 1, %s1330_s2  }
  0xbf   : > { %169 = vmatpush1.msra.mxu0 %v162_v17  ;;  %v153_v27 = vld [vmem:[#allocation6 + $0x98] sm:$0xff]  ;;  %v152_v28 = vld [vmem:[#allocation6 + $0x90] sm:$0xff]  ;;  %v151_v29 = vld [vmem:[#allocation6 + $0x88] sm:$0xff]  ;;  %p89_p1 = scmp.ge.s32.totalorder %s92_s2, 8  }
  0xc0   : > { %170 = vmatprep.subr.mxu0 %v161_v19  ;;  %v150_v30 = vld [vmem:[#allocation6 + $0x80] sm:$0xff]  ;;  %v149_v31 = vld [vmem:[#allocation6 + $0x78] sm:$0xff]  ;;  %v148_v32 = vld [vmem:[#allocation6 + $0x70] sm:$0xff]  ;;  %s1344_s13 = smov (%p89_p1), [#allocation9]  }
  0xc1   : > { %171 = vmatpush1.msra.mxu0 %v160_v20  ;;  %v147_v33 = vld [vmem:[#allocation6 + $0x68] sm:$0xff]  ;;  %v146_v34 = vld [vmem:[#allocation6 + $0x60] sm:$0xff]  ;;  %v145_v35 = vld [vmem:[#allocation6 + $0x58] sm:$0xff]  ;;  %s949_s14 = sshll.u32 (%p89_p1), %s1344_s13, 4  ;;  %s950_s14 = int_to_ptr.vmem [resolvable:$true] %s949_s14 }
  0xc2   : > { %172 = vmatprep.subr.mxu0 %v159_v21  ;;  %v144_v36 = vld [vmem:[#allocation6 + $0x50] sm:$0xff]  ;;  %v143_v37 = vld [vmem:[#allocation6 + $0x48] sm:$0xff]  ;;  %v142_v38 = vld [vmem:[#allocation6 + $0x40] sm:$0xff]  ;;  %s1282_s15 = scalar_lea.vmem (%p89_p1), %s950_s14, 1024  ;;  %p1287_p3 = scmp.lt.s32.totalorder (%p89_p1), %s950_s14, %s950_s14 }
  0xc3   : > { %173 = vmatpush1.msra.mxu0 %v158_v22  ;;  %v141_v39 = vld [vmem:[#allocation6 + $0x38] sm:$0xff]  ;;  %v140_v40 = vld [vmem:[#allocation6 + $0x30] sm:$0xff]  ;;  %v139_v41 = vld [vmem:[#allocation6 + $0x28] sm:$0xff]  ;;  %p1283_p2 = scmp.ne.s32.totalorder (%p89_p1), %s950_s14, %s1282_s15  ;;  %p1288_p4 = scmp.lt.s32.totalorder (%p89_p1), %s1282_s15, %s1282_s15 }
  0xc4   : > { %174 = vmatprep.subr.mxu0 %v157_v23  ;;  %v138_v42 = vld [vmem:[#allocation6 + $0x20] sm:$0xff]  ;;  %v137_v43 = vld [vmem:[#allocation6 + $0x18] sm:$0xff]  ;;  %v136_v44 = vld [vmem:[#allocation6 + $0x10] sm:$0xff] }
  0xc5   : > { %175 = vmatpush1.msra.mxu0 %v156_v24  ;;  %v135_v45 = vld [vmem:[#allocation6 + $0x8] sm:$0xff]  ;;  %v134_v46 = vld [vmem:[#allocation6] sm:$0xff]  ;;  %p1289_p5 = por (%p89_p1), %p1288_p4, %p1287_p3 }
  0xc6   : > { %176 = vmatprep.subr.mxu0 %v155_v25  ;;  %v1420_v47 = vld [vmem:[%s1417_s10 + $0x8] sm:$0xff] }
  0xc7   : > { %177 = vmatpush1.msra.mxu0 %v154_v26  ;;  %v406_v48 = vmul.f32 %v1420_v47, %v1420_v47  ;;  %p1290_p6 = pnand (%p89_p1), %p1289_p5, %p1283_p2 }
  0xc8   : > { %178 = vmatprep.subr.mxu0 %v153_v27  ;;  %v1079_v52 = vpop.eup %1078 }
  0xc9   : > { %179 = vmatpush1.msra.mxu0 %v152_v28  ;;  %407 = vadd.xlane.f32.xlu1 %v406_v48  ;;  %v102_v53 = vmul.f32 %v1322_v12, %v1079_v52 }
  0xca   : > { %180 = vmatprep.subr.mxu0 %v151_v29 }
  0xcb   : > { %181 = vmatpush1.msra.mxu0 %v150_v30  ;;  %v104_v55 = vsel %vm103_vm4, %v1322_v12, %v102_v53 }
  0xcc   : > { %182 = vmatprep.subr.mxu0 %v149_v31  ;;  %v107_v56 = vsel %vm105_vm5, %v106_v54, %v104_v55  ;;  %vm1343_vm5 = vmmov 0  }
  0xcd   : > { %183 = vmatpush1.msra.mxu0 %v148_v32  ;;  %v108_v57 = vmax.f32 %v107_v56, 1e-15  ;;  %1038 = vmatprep.mubr.msk.f32.mxu1 %vm1343_vm5, %v1342_v18 }
  0xce   : > { %184 = vmatprep.subr.mxu0 %v147_v33 }
  0xcf   : > { %185 = vmatpush1.msra.mxu0 %v146_v34  ;;  %v979_v58 = vclamps-f32 %v108_v57, 0.9999999 }
  0xd0   : > { %186 = vmatprep.subr.mxu0 %v145_v35 }
  0xd1   : > { %187 = vmatpush1.msra.mxu0 %v144_v36  ;;  %v120_v59 = vsub.f32 0.0, %v979_v58  ;;  %v111_v60 = vadd.f32 1.0, %v979_v58  ;;  %v114_v62 = vmul.f32 -0.5, %v979_v58  ;;  %v117_v7 = vand.u32 2147483647, %v979_v58 }
  0xd2   : > { %188 = vmatprep.subr.mxu0 %v143_v37 }
  0xd3   : > { %189 = vmatpush1.msra.mxu0 %v142_v38  ;;  %v121_v61 = vadd.f32 1.0, %v120_v59  ;;  %1080 = vlog2.f32 %v111_v60  ;;  %v124_v63 = vmul.f32 -0.5, %v120_v59  ;;  %v115_v2 = vadd.f32 1.0, %v114_v62 }
  0xd4   : > { %190 = vmatprep.subr.mxu0 %v141_v39  ;;  %v127_v8 = vand.u32 2147483647, %v120_v59  ;;  %vm118_vm6 = vcmp.lt.f32.partialorder %v117_v7, 0.0004427343  ;;  %v1443_v7 = vshrl.u32 %v78_v0, 7 }
  0xd5   : > { %191 = vmatpush1.msra.mxu0 %v140_v40  ;;  %1082 = vlog2.f32 %v121_v61  ;;  %v125_v5 = vadd.f32 1.0, %v124_v63  ;;  %v116_v16 = vmul.f32 %v979_v58, %v115_v2 }
  0xd6   : > { %192 = vmatprep.subr.mxu0 %v139_v41  ;;  %1084 = vrcp.f32 %v108_v57  ;;  %vm128_vm7 = vcmp.lt.f32.partialorder %v127_v8, 0.0004427343 }
  0xd7   : > { %193 = vmatpush1.msra.mxu0 %v138_v42  ;;  %v126_v19 = vmul.f32 %v125_v5, %v120_v59 }
  0xd8   : > { %194 = vmatprep.subr.mxu0 %v137_v43 }
  0xd9   : > { %195 = vmatpush1.msra.mxu0 %v136_v44 }
  0xda   : > { %196 = vmatprep.subr.mxu0 %v135_v45 }
  0xdb   : > { %197 = vmatpush1.msra.mxu0 %v134_v46 }
  0xdc   : > { %231 = vmatmul.mubr.f32.vlgmr.msra.gmra.mxu0 %v1326_v13 }
  0xe0   : > { %v1081_v1 = vpop.eup %1080 }
  0xe1   : > { %v113_v15 = vmul.f32 0.6931472, %v1081_v1 }
  0xe2   : > { %v1083_v6 = vpop.eup %1082 }
  0xe3   : > { %v123_v17 = vmul.f32 0.6931472, %v1083_v6  ;;  %v119_v20 = vsel %vm118_vm6, %v116_v16, %v113_v15  ;;  %v1085_v23 = vpop.eup %1084 }
  0xe5   : > { %v129_v21 = vsel %vm128_vm7, %v126_v19, %v123_v17 }
  0xe6   : > { %v130_v22 = vsub.f32 %v119_v20, %v129_v21 }
  0xe8   : > { %v131_v24 = vmul.f32 0.5, %v130_v22 }
  0xea   : > { %v1436_v29 = vmul.f32 %v1085_v23, %v131_v24 }
 0x152   : > { %v408_v46 = vpop.xlane.xlu1 %407 }
 0x19c   : > { %v1424_v49 = vpop.f32.mrf.mxu0 }
 0x19e   : > { %v1426_v50 = vpop.f32.mrf.mxu0 }
 0x19f   : > { %v262_v51 = vmul.f32 %v1426_v50, %v1426_v50 }
 0x1a1   : > { %263 = vadd.xlane.f32.xlu0 %v262_v51 }
 0x22a   : > { %v264_v14 = vpop.xlane.xlu0 %263 }
 0x22b   : > { %1086 = vrsqrt.f32 %v264_v14  ;;  %vm267_vm8 = vcmp.eq.f32.partialorder %v264_v14, inf  ;;  %v270_v27 = vand.u32 2147483648, %v264_v14  ;;  %vm269_vm9 = vcmp.eq.f32.partialorder %v264_v14, 0.0 }
 0x238   : > { %v1087_v25 = vpop.eup %1086 }
 0x239   : > { %v266_v26 = vmul.f32 %v1087_v25, %v264_v14 }
 0x23b   : > { %v268_v28 = vsel %vm267_vm8, %v264_v14, %v266_v26  ;;  %v445_v14 = vsub.s32 1, %v1443_v7 }
 0x23c   : > { %v271_v30 = vsel %vm269_vm9, %v270_v27, %v268_v28 }
 0x23d   : > { %v272_v31 = vmax.f32 %v271_v30, 1e-15  ;;  %v446_v16 = vrot.slane %v1388_v4, %v445_v14  ;;  %v455_v27 = vrot.slane %v1396_v11, %v445_v14 }
 0x23f   : > { %v273_v32 = vmul.f32 %v272_v31, %v1436_v29  ;;  %1088 = vrcp.f32 %v272_v31 }
 0x241   : > { %1090 = vtanh.f32 %v273_v32 }
 0x24c   : > { %v1089_v33 = vpop.eup %1088 }
 0x24e   : > { %v1091_v34 = vpop.eup %1090 }
 0x24f   : > { %v276_v35 = vmul.f32 %v1091_v34, %v1089_v33 }
 0x251   : > { %v277_v36 = vmul.f32 %v276_v35, %v271_v30 }
 0x253   : > { %v278_v37 = vmax.f32 %v277_v36, 1e-15 }
 0x255   : > { %1092 = vrcp.f32 %v278_v37  ;;  %vm279_vm10 = vcmp.gt.f32.partialorder %v278_v37, 0.996  ;;  %v285_v44 = vmin.f32 %v278_v37, 0.996 }
 0x257   : > { %v286_v45 = vmul.f32 %v285_v44, %v285_v44 }
 0x259   : > { %v415_v52 = vsub.f32 1.0, %v286_v45  ;;  %v419_v53 = vmul.f32 %v408_v46, %v286_v45 }
 0x25b   : > { %v417_v58 = vmul.f32 %v415_v52, %v1420_v47 }
 0x262   : > { %v1093_v38 = vpop.eup %1092 }
 0x263   : > { %v281_v39 = vmul.f32 0.996, %v1093_v38 }
 0x265   : > { %v282_v40 = vsel %vm279_vm10, %v281_v39, 1.0 }
 0x266   : > { %v283_v41 = vmul.f32 %v282_v40, %v276_v35 }
 0x268   : > { %v284_v42 = vmul.f32 %v283_v41, %v1426_v50 }
 0x26a   : > { %v409_v43 = vmul.f32 %v284_v42, %v1420_v47 }
 0x26c   : > { %410 = vadd.xlane.f32.xlu0 %v409_v43 }
 0x2f5   : > { %v411_v48 = vpop.xlane.xlu0 %410 }
 0x2f6   : > { %v412_v51 = vmul.f32 2.0, %v411_v48 }
 0x2f8   : > { %v413_v54 = vadd.f32 1.0, %v412_v51 }
 0x2fa   : > { %v414_v55 = vadd.f32 %v413_v54, %v408_v46  ;;  %v420_v56 = vadd.f32 %v419_v53, %v413_v54 }
 0x2fc   : > { %v416_v57 = vmul.f32 %v414_v55, %v284_v42  ;;  %v421_v61 = vmax.f32 %v420_v56, 1e-15 }
 0x2fe   : > { %v418_v59 = vadd.f32 %v417_v58, %v416_v57 }
 0x300   : > { %v422_v60 = vmul.f32 %v418_v59, %v418_v59 }
 0x302   : > { %423 = vadd.xlane.f32.xlu1 %v422_v60 }
 0x38b   : > { %v424_v50 = vpop.xlane.xlu1 %423 }
 0x38c   : > { %1094 = vrsqrt.f32 %v424_v50  ;;  %vm427_vm11 = vcmp.eq.f32.partialorder %v424_v50, inf  ;;  %v430_v1 = vand.u32 2147483648, %v424_v50  ;;  %vm429_vm12 = vcmp.eq.f32.partialorder %v424_v50, 0.0 }
 0x38d   : > { %1096 = vrcp.f32 %v421_v61 }
 0x399   : > { %v1095_v62 = vpop.eup %1094 }
 0x39a   : > { %v426_v63 = vmul.f32 %v1095_v62, %v424_v50  ;;  %v1097_v5 = vpop.eup %1096 }
 0x39c   : > { %v428_v2 = vsel %vm427_vm11, %v424_v50, %v426_v63 }
 0x39d   : > { %v431_v6 = vsel %vm429_vm12, %v430_v1, %v428_v2 }
 0x39e   : > { %v433_v8 = vmul.f32 %v1097_v5, %v431_v6 }
 0x3a0   : > { %v434_v47 = vmax.f32 %v433_v8, 1e-15 }
 0x3a2   : > { %1098 = vrcp.f32 %v434_v47  ;;  %v441_v15 = vmin.f32 %v434_v47, 0.996  ;;  %vm435_vm13 = vcmp.gt.f32.partialorder %v434_v47, 0.996 }
 0x3a4   : > { %v442_v17 = vmul.f32 %v441_v15, %v441_v15 }
 0x3a6   : > { %v457_v19 = vsub.f32 1.0, %v442_v17  ;;  %v461_v31 = vmul.f32 %v455_v27, %v442_v17 }
 0x3a8   : > { %v459_v20 = vmul.f32 %v457_v19, %v446_v16 }
 0x3af   : > { %v1099_v21 = vpop.eup %1098 }
 0x3b0   : > { %v437_v22 = vmul.f32 0.996, %v1099_v21 }
 0x3b2   : > { %v438_v23 = vsel %vm435_vm13, %v437_v22, 1.0 }
 0x3b3   : > { %v439_v24 = vmul.f32 %v1097_v5, %v438_v23 }
 0x3b5   : > { %v440_v25 = vmul.f32 %v439_v24, %v418_v59 }
 0x3b7   : > { %v447_v26 = vmul.f32 %v446_v16, %v440_v25 }
 0x3b9   : > { %448 = vadd.xlane.f32.xlu0 %v447_v26 }
 0x442   : > { %v449_v28 = vpop.xlane.xlu0 %448 }
 0x443   : > { %v450_v30 = vmul.f32 2.0, %v449_v28 }
 0x445   : > { %v451_v32 = vadd.f32 1.0, %v450_v30 }
 0x447   : > { %v456_v33 = vadd.f32 %v455_v27, %v451_v32  ;;  %v462_v34 = vadd.f32 %v461_v31, %v451_v32 }
 0x449   : > { %v458_v35 = vmul.f32 %v456_v33, %v440_v25  ;;  %v463_v39 = vmax.f32 %v462_v34, 1e-15 }
 0x44b   : > { %v460_v36 = vadd.f32 %v459_v20, %v458_v35 }
 0x44d   : > { %v464_v37 = vmul.f32 %v460_v36, %v460_v36 }
 0x44f   : > { %465 = vadd.xlane.f32.xlu1 %v464_v37 }
 0x4d8   : > { %v466_v38 = vpop.xlane.xlu1 %465 }
 0x4d9   : > { %1100 = vrsqrt.f32 %v466_v38  ;;  %vm469_vm14 = vcmp.eq.f32.partialorder %v466_v38, inf  ;;  %v472_v42 = vand.u32 2147483648, %v466_v38  ;;  %vm471_vm15 = vcmp.eq.f32.partialorder %v466_v38, 0.0 }
 0x4da   : > { %1102 = vrcp.f32 %v463_v39 }
 0x4e6   : > { %v1101_v40 = vpop.eup %1100 }
 0x4e7   : > { %v468_v41 = vmul.f32 %v1101_v40, %v466_v38  ;;  %v1103_v44 = vpop.eup %1102 }
 0x4e9   : > { %v470_v43 = vsel %vm469_vm14, %v466_v38, %v468_v41  ;;  %v637_v41 = vld [vmem:[#allocation8 + $0x78] sm:$0xff] }
 0x4ea   : > { %v473_v45 = vsel %vm471_vm15, %v472_v42, %v470_v43  ;;  %v636_v42 = vld [vmem:[#allocation8 + $0x70] sm:$0xff]  ;;  %1007 = vmatpush3.msra.mxu1 %v637_v41 }
 0x4eb   : > { %v475_v46 = vmul.f32 %v1103_v44, %v473_v45  ;;  %v1457_v43 = vld [vmem:[%s1417_s10 + $0x10] sm:$0xff]  ;;  %1008 = vmatprep.subr.mxu1 %v1342_v18 }
 0x4ec   : > { %v733_v45 = vmul.f32 %v1457_v43, %v1457_v43  ;;  %1009 = vmatpush3.msra.mxu1 %v636_v42 }
 0x4ed   : > { %v476_v48 = vmax.f32 %v475_v46, 1e-15  ;;  %1010 = vmatprep.subr.mxu1 %v1342_v18  ;;  %v634_v46 = vld [vmem:[#allocation8 + $0x60] sm:$0xff] }
 0x4ef   : > { %1104 = vrcp.f32 %v476_v48  ;;  %v483_v51 = vmin.f32 %v476_v48, 0.996  ;;  %vm477_vm0 = vcmp.gt.f32.partialorder %v476_v48, 0.996  ;;  %v633_v48 = vld [vmem:[#allocation8 + $0x58] sm:$0xff] }
 0x4f1   : > { %v484_v52 = vmul.f32 %v483_v51, %v483_v51  ;;  %v632_v51 = vld [vmem:[#allocation8 + $0x50] sm:$0xff] }
 0x4f3   : > { %1106 = vrsqrt.f32 %v484_v52  ;;  %vm487_vm1 = vcmp.eq.f32.partialorder %v484_v52, inf  ;;  %v490_v59 = vand.u32 2147483648, %v484_v52  ;;  %vm489_vm2 = vcmp.eq.f32.partialorder %v484_v52, 0.0 }
 0x4fc   : > { %v1105_v53 = vpop.eup %1104 }
 0x4fd   : > { %v479_v54 = vmul.f32 0.996, %v1105_v53  ;;  %v630_v53 = vld [vmem:[#allocation8 + $0x40] sm:$0xff] }
 0x4ff   : > { %v480_v55 = vsel %vm477_vm0, %v479_v54, 1.0  ;;  %v629_v54 = vld [vmem:[#allocation8 + $0x38] sm:$0xff] }
 0x500   : > { %v1107_v56 = vpop.eup %1106  ;;  %v481_v57 = vmul.f32 %v1103_v44, %v480_v55  ;;  %v635_v44 = vld [vmem:[#allocation8 + $0x68] sm:$0xff]  ;;  %v628_v55 = vld [vmem:[#allocation8 + $0x30] sm:$0xff] }
 0x501   : > { %v486_v58 = vmul.f32 %v1107_v56, %v484_v52  ;;  %1011 = vmatpush3.msra.mxu1 %v635_v44  ;;  %v627_v56 = vld [vmem:[#allocation8 + $0x28] sm:$0xff] }
 0x502   : > { %v482_v28 = vmul.f32 %v481_v57, %v460_v36  ;;  %v237_v36 = vmul.f32 %v1424_v49, %v1424_v49  ;;  %1012 = vmatprep.subr.mxu1 %v1342_v18  ;;  %v626_v57 = vld [vmem:[#allocation8 + $0x20] sm:$0xff] }
 0x503   : > { %v488_v60 = vsel %vm487_vm1, %v484_v52, %v486_v58  ;;  %1013 = vmatpush3.msra.mxu1 %v634_v46  ;;  %v631_v52 = vld [vmem:[#allocation8 + $0x48] sm:$0xff]  ;;  %v625_v58 = vld [vmem:[#allocation8 + $0x18] sm:$0xff] }
 0x504   : > { %v491_v50 = vsel %vm489_vm2, %v490_v59, %v488_v60  ;;  %1014 = vmatprep.subr.mxu1 %v1342_v18  ;;  %v624_v59 = vld [vmem:[#allocation8 + $0x10] sm:$0xff]  ;;  %v623_v60 = vld [vmem:[#allocation8 + $0x8] sm:$0xff] }
 0x505   : > { %v492_v61 = vmax.f32 %v491_v50, 1e-15  ;;  %1015 = vmatpush3.msra.mxu1 %v633_v48  ;;  %v622_v50 = vld [vmem:[#allocation8] sm:$0xff] }
 0x506   : > { %1016 = vmatprep.subr.mxu1 %v1342_v18 }
 0x507   : > { %v982_v62 = vclamps-f32 %v492_v61, 0.9999999  ;;  %1017 = vmatpush3.msra.mxu1 %v632_v51 }
 0x508   : > { %1018 = vmatprep.subr.mxu1 %v1342_v18 }
 0x509   : > { %v495_v63 = vadd.f32 1.0, %v982_v62  ;;  %v504_v1 = vsub.f32 0.0, %v982_v62  ;;  %v498_v5 = vmul.f32 -0.5, %v982_v62  ;;  %v501_v15 = vand.u32 2147483647, %v982_v62  ;;  %1019 = vmatpush3.msra.mxu1 %v631_v52 }
 0x50a   : > { %1020 = vmatprep.subr.mxu1 %v1342_v18 }
 0x50b   : > { %1108 = vlog2.f32 %v495_v63  ;;  %v505_v2 = vadd.f32 1.0, %v504_v1  ;;  %v508_v6 = vmul.f32 -0.5, %v504_v1  ;;  %v499_v8 = vadd.f32 1.0, %v498_v5  ;;  %1021 = vmatpush3.msra.mxu1 %v630_v53 }
 0x50c   : > { %v511_v16 = vand.u32 2147483647, %v504_v1  ;;  %vm502_vm3 = vcmp.lt.f32.partialorder %v501_v15, 0.0004427343  ;;  %1022 = vmatprep.subr.mxu1 %v1342_v18 }
 0x50d   : > { %1110 = vlog2.f32 %v505_v2  ;;  %v509_v47 = vadd.f32 1.0, %v508_v6  ;;  %v500_v20 = vmul.f32 %v982_v62, %v499_v8  ;;  %1023 = vmatpush3.msra.mxu1 %v629_v54 }
 0x50e   : > { %1112 = vrcp.f32 %v492_v61  ;;  %vm512_vm4 = vcmp.lt.f32.partialorder %v511_v16, 0.0004427343  ;;  %1024 = vmatprep.subr.mxu1 %v1342_v18 }
 0x50f   : > { %v510_v22 = vmul.f32 %v509_v47, %v504_v1  ;;  %1025 = vmatpush3.msra.mxu1 %v628_v55 }
 0x510   : > { %1026 = vmatprep.subr.mxu1 %v1342_v18 }
 0x511   : > { %1027 = vmatpush3.msra.mxu1 %v627_v56 }
 0x512   : > { %1028 = vmatprep.subr.mxu1 %v1342_v18 }
 0x513   : > { %1029 = vmatpush3.msra.mxu1 %v626_v57 }
 0x514   : > { %1030 = vmatprep.subr.mxu1 %v1342_v18 }
 0x515   : > { %1031 = vmatpush3.msra.mxu1 %v625_v58 }
 0x516   : > { %1032 = vmatprep.subr.mxu1 %v1342_v18 }
 0x517   : > { %1033 = vmatpush3.msra.mxu1 %v624_v59 }
 0x518   : > { %v1109_v14 = vpop.eup %1108  ;;  %1034 = vmatprep.subr.mxu1 %v1342_v18 }
 0x519   : > { %v497_v17 = vmul.f32 0.6931472, %v1109_v14  ;;  %1035 = vmatpush3.msra.mxu1 %v623_v60 }
 0x51a   : > { %v1111_v19 = vpop.eup %1110  ;;  %1036 = vmatprep.subr.mxu1 %v1342_v18 }
 0x51b   : > { %v507_v21 = vmul.f32 0.6931472, %v1111_v19  ;;  %v503_v23 = vsel %vm502_vm3, %v500_v20, %v497_v17  ;;  %v1113_v27 = vpop.eup %1112  ;;  %1037 = vmatpush3.msra.mxu1 %v622_v50 }
 0x51d   : > { %v513_v24 = vsel %vm512_vm4, %v510_v22, %v507_v21 }
 0x51e   : > { %v514_v25 = vsub.f32 %v503_v23, %v513_v24 }
 0x520   : > { %v515_v26 = vmul.f32 0.5, %v514_v25 }
 0x522   : > { %v517_v30 = vmul.f32 %v1113_v27, %v515_v26 }
 0x524   : > { %v518_v31 = vmul.f32 %v517_v30, %v482_v28 }
 0x526   : > { %v983_v32 = vmul.f32 -1.442695, %v518_v31 }
 0x528   : > { %1114 = vpow2.f32 %v983_v32 }
 0x535   : > { %v1115_v33 = vpop.eup %1114 }
 0x536   : > { %v522_v34 = vadd.f32 1.0, %v1115_v33 }
 0x538   : > { %1116 = vrcp.f32 %v522_v34 }
 0x545   : > { %v1117_v35 = vpop.eup %1116 }
 0x546   : > { %v526_v37 = vmul.f32 %v1117_v35, %v1383_v3 }
 0x548   : > { %v527_v38 = vmul.f32 %v526_v37, %v526_v37  ;;  %v1450_v39 = vmul.f32 %v1326_v13, %v526_v37 }
 0x54a   : > { %528 = vadd.xlane.f32.xlu0 %v527_v38  ;;  %v564_v40 = vmul.f32 %v1450_v39, %v1450_v39 }
 0x54c   : > { %565 = vadd.xlane.f32.xlu1 %v564_v40 }
 0x550   : > { %238 = vadd.xlane.f32.xlu1 %v237_v36 }
 0x554   : > { %734 = vadd.xlane.f32.xlu1 %v733_v45 }
 0x5d3   : > { %v529_v61 = vpop.xlane.xlu0 %528 }
 0x5d4   : > { %1118 = vrsqrt.f32 %v529_v61  ;;  %vm532_vm6 = vcmp.eq.f32.partialorder %v529_v61, inf  ;;  %v535_v5 = vand.u32 2147483648, %v529_v61  ;;  %vm534_vm7 = vcmp.eq.f32.partialorder %v529_v61, 0.0 }
 0x5d5   : > { %v566_v62 = vpop.xlane.xlu1 %565 }
 0x5d6   : > { %vm569_vm10 = vcmp.eq.f32.partialorder %v566_v62, inf  ;;  %v572_v44 = vand.u32 2147483648, %v566_v62  ;;  %vm571_vm13 = vcmp.eq.f32.partialorder %v566_v62, 0.0 }
 0x5d9   : > { %v239_v63 = vpop.xlane.xlu1 %238 }
 0x5da   : > { %1120 = vrsqrt.f32 %v239_v63  ;;  %vm242_vm8 = vcmp.eq.f32.partialorder %v239_v63, inf  ;;  %v245_v18 = vand.u32 2147483648, %v239_v63  ;;  %vm244_vm9 = vcmp.eq.f32.partialorder %v239_v63, 0.0 }
 0x5db   : > { %1122 = vrsqrt.f32 %v566_v62 }
 0x5e1   : > { %v1119_v1 = vpop.eup %1118 }
 0x5e2   : > { %v531_v2 = vmul.f32 %v1119_v1, %v529_v61 }
 0x5e4   : > { %v533_v6 = vsel %vm532_vm6, %v529_v61, %v531_v2 }
 0x5e5   : > { %v536_v8 = vsel %vm534_vm7, %v535_v5, %v533_v6  ;;  %v1486_v6 = vld [vmem:[%s1417_s10] sm:$0xff] }
 0x5e6   : > { %v537_v47 = vmax.f32 %v536_v8, 1e-15 }
 0x5e7   : > { %v1121_v14 = vpop.eup %1120 }
 0x5e8   : > { %v984_v15 = vclamps-f32 %v537_v47, 0.9999999  ;;  %v241_v16 = vmul.f32 %v1121_v14, %v239_v63  ;;  %v1123_v27 = vpop.eup %1122 }
 0x5e9   : > { %v568_v30 = vmul.f32 %v1123_v27, %v566_v62 }
 0x5ea   : > { %v549_v17 = vsub.f32 0.0, %v984_v15  ;;  %v243_v19 = vsel %vm242_vm8, %v239_v63, %v241_v16  ;;  %v540_v20 = vadd.f32 1.0, %v984_v15  ;;  %v543_v25 = vmul.f32 -0.5, %v984_v15 }
 0x5eb   : > { %v246_v21 = vsel %vm244_vm9, %v245_v18, %v243_v19  ;;  %v546_v33 = vand.u32 2147483647, %v984_v15  ;;  %v570_v36 = vsel %vm569_vm10, %v566_v62, %v568_v30 }
 0x5ec   : > { %v247_v22 = vmax.f32 %v246_v21, 1e-15  ;;  %1124 = vlog2.f32 %v540_v20  ;;  %v550_v23 = vadd.f32 1.0, %v549_v17  ;;  %v553_v26 = vmul.f32 -0.5, %v549_v17 }
 0x5ed   : > { %v544_v31 = vadd.f32 1.0, %v543_v25  ;;  %v556_v34 = vand.u32 2147483647, %v549_v17  ;;  %vm547_vm11 = vcmp.lt.f32.partialorder %v546_v33, 0.0004427343  ;;  %v573_v53 = vsel %vm571_vm13, %v572_v44, %v570_v36 }
 0x5ee   : > { %v248_v24 = vmul.f32 %v247_v22, %v1436_v29  ;;  %1126 = vrcp.f32 %v247_v22  ;;  %v554_v32 = vadd.f32 1.0, %v553_v26  ;;  %v574_v57 = vmax.f32 %v573_v53, 1e-15 }
 0x5ef   : > { %1128 = vlog2.f32 %v550_v23  ;;  %v545_v29 = vmul.f32 %v984_v15, %v544_v31  ;;  %vm557_vm12 = vcmp.lt.f32.partialorder %v556_v34, 0.0004427343 }
 0x5f0   : > { %1130 = vtanh.f32 %v248_v24  ;;  %v555_v42 = vmul.f32 %v554_v32, %v549_v17 }
 0x5f1   : > { %1132 = vrcp.f32 %v537_v47 }
 0x5f9   : > { %v1125_v28 = vpop.eup %1124 }
 0x5fa   : > { %v542_v37 = vmul.f32 0.6931472, %v1125_v28 }
 0x5fb   : > { %v1127_v35 = vpop.eup %1126 }
 0x5fc   : > { %v1129_v38 = vpop.eup %1128  ;;  %v548_v46 = vsel %vm547_vm11, %v545_v29, %v542_v37 }
 0x5fd   : > { %v1131_v40 = vpop.eup %1130  ;;  %v552_v41 = vmul.f32 0.6931472, %v1129_v38 }
 0x5fe   : > { %v251_v45 = vmul.f32 %v1131_v40, %v1127_v35  ;;  %v1133_v56 = vpop.eup %1132 }
 0x5ff   : > { %v558_v48 = vsel %vm557_vm12, %v555_v42, %v552_v41 }
 0x600   : > { %v252_v51 = vmul.f32 %v251_v45, %v246_v21  ;;  %v559_v52 = vsub.f32 %v548_v46, %v558_v48 }
 0x602   : > { %v1478_v54 = vmax.f32 %v252_v51, 1e-15  ;;  %v560_v55 = vmul.f32 0.5, %v559_v52 }
 0x604   : > { %1134 = vrcp.f32 %v1478_v54  ;;  %v562_v58 = vmul.f32 %v1133_v56, %v560_v55  ;;  %vm254_vm14 = vcmp.gt.f32.partialorder %v1478_v54, 0.996 }
 0x605   : > { %1136 = vrcp.f32 %v574_v57 }
 0x606   : > { %v575_v59 = vmul.f32 %v574_v57, %v562_v58 }
 0x608   : > { %1138 = vtanh.f32 %v575_v59 }
 0x611   : > { %v1135_v60 = vpop.eup %1134 }
 0x612   : > { %v256_v50 = vmul.f32 0.996, %v1135_v60  ;;  %v1137_v61 = vpop.eup %1136 }
 0x614   : > { %v257_v62 = vsel %vm254_vm14, %v256_v50, 1.0 }
 0x615   : > { %v1139_v63 = vpop.eup %1138  ;;  %v258_v1 = vmul.f32 %v257_v62, %v251_v45 }
 0x616   : > { %v578_v2 = vmul.f32 %v1139_v63, %v1137_v61 }
 0x617   : > { %v1483_v5 = vmul.f32 %v258_v1, %v1424_v49 }
 0x618   : > { %v579_v8 = vmul.f32 %v578_v2, %v573_v53 }
 0x619   : > { %v290_v47 = vmul.f32 %v1483_v5, %v1486_v6 }
 0x61a   : > { %v580_v14 = vmax.f32 %v579_v8, 1e-15 }
 0x61b   : > { %291 = vadd.xlane.f32.xlu1 %v290_v47 }
 0x61c   : > { %1140 = vrcp.f32 %v580_v14  ;;  %vm581_vm15 = vcmp.gt.f32.partialorder %v580_v14, 0.996  ;;  %v587_v22 = vmin.f32 %v580_v14, 0.996 }
 0x61e   : > { %v588_v23 = vmul.f32 %v587_v22, %v587_v22 }
 0x620   : > { %1142 = vrsqrt.f32 %v588_v23  ;;  %vm591_vm0 = vcmp.eq.f32.partialorder %v588_v23, inf  ;;  %v594_v27 = vand.u32 2147483648, %v588_v23  ;;  %vm593_vm1 = vcmp.eq.f32.partialorder %v588_v23, 0.0 }
 0x629   : > { %v1141_v15 = vpop.eup %1140 }
 0x62a   : > { %v583_v16 = vmul.f32 0.996, %v1141_v15 }
 0x62c   : > { %v584_v18 = vsel %vm581_vm15, %v583_v16, 1.0 }
 0x62d   : > { %v585_v17 = vmul.f32 %v584_v18, %v578_v2  ;;  %v1143_v24 = vpop.eup %1142 }
 0x62e   : > { %v590_v25 = vmul.f32 %v1143_v24, %v588_v23 }
 0x62f   : > { %v586_v19 = vmul.f32 %v585_v17, %v1450_v39 }
 0x630   : > { %v592_v26 = vsel %vm591_vm0, %v588_v23, %v590_v25  ;;  %v735_v25 = vpop.xlane.xlu1 %734 }
 0x631   : > { %1039 = vmatmul.mubr.f32.vlgmr.msra.gmra.mxu1 %v586_v19  ;;  %v595_v28 = vsel %vm593_vm1, %v594_v27, %v592_v26 }
 0x632   : > { %v596_v30 = vmax.f32 %v595_v28, 1e-15 }
 0x634   : > { %v985_v39 = vclamps-f32 %v596_v30, 0.9999999 }
 0x636   : > { %v608_v31 = vsub.f32 0.0, %v985_v39  ;;  %v599_v33 = vadd.f32 1.0, %v985_v39  ;;  %v602_v37 = vmul.f32 -0.5, %v985_v39  ;;  %v605_v44 = vand.u32 2147483647, %v985_v39 }
 0x638   : > { %v609_v32 = vadd.f32 1.0, %v608_v31  ;;  %v612_v34 = vmul.f32 -0.5, %v608_v31  ;;  %v615_v29 = vand.u32 2147483647, %v608_v31  ;;  %v603_v41 = vadd.f32 1.0, %v602_v37 }
 0x639   : > { %vm606_vm3 = vcmp.lt.f32.partialorder %v605_v44, 0.0004427343 }
 0x63a   : > { %1144 = vlog2.f32 %v609_v32  ;;  %v613_v40 = vadd.f32 1.0, %v612_v34  ;;  %vm616_vm2 = vcmp.lt.f32.partialorder %v615_v29, 0.0004427343  ;;  %v604_v48 = vmul.f32 %v985_v39, %v603_v41 }
 0x63b   : > { %1146 = vlog2.f32 %v599_v33 }
 0x63c   : > { %v614_v46 = vmul.f32 %v613_v40, %v608_v31 }
 0x647   : > { %v1145_v38 = vpop.eup %1144 }
 0x648   : > { %v1147_v36 = vpop.eup %1146  ;;  %v611_v42 = vmul.f32 0.6931472, %v1145_v38 }
 0x649   : > { %v601_v45 = vmul.f32 0.6931472, %v1147_v36 }
 0x64a   : > { %v617_v51 = vsel %vm616_vm2, %v614_v46, %v611_v42 }
 0x64b   : > { %v607_v52 = vsel %vm606_vm3, %v604_v48, %v601_v45 }
 0x64c   : > { %v618_v53 = vsub.f32 %v607_v52, %v617_v51 }
 0x64e   : > { %v619_v57 = vmul.f32 0.5, %v618_v53 }
 0x6a4   : > { %v292_v37 = vpop.xlane.xlu1 %291 }
 0x6a5   : > { %v293_v38 = vmul.f32 2.0, %v292_v37 }
 0x6a7   : > { %v294_v41 = vadd.f32 1.0, %v293_v38 }
 0x6f1   : > { %v1491_v20 = vpop.f32.mrf.mxu1 }
 0x6f2   : > { %v708_v49 = vmul.f32 %v1491_v20, %v1491_v20 }
 0x6f3   : > { %v1040_v21 = vpop.f32.mrf.mxu1 }
 0x6f4   : > { %709 = vadd.xlane.f32.xlu0 %v708_v49 }
 0x77d   : > { %v710_v35 = vpop.xlane.xlu0 %709 }
 0x77e   : > { %1148 = vrsqrt.f32 %v710_v35  ;;  %vm713_vm4 = vcmp.eq.f32.partialorder %v710_v35, inf  ;;  %v716_v58 = vand.u32 2147483648, %v710_v35  ;;  %vm715_vm5 = vcmp.eq.f32.partialorder %v710_v35, 0.0 }
 0x77f   : > { %1150 = vrcp.f32 %v596_v30 }
 0x78b   : > { %v1149_v55 = vpop.eup %1148 }
 0x78c   : > { %v712_v56 = vmul.f32 %v1149_v55, %v710_v35  ;;  %v1151_v60 = vpop.eup %1150 }
 0x78d   : > { %v621_v61 = vmul.f32 %v1151_v60, %v619_v57 }
 0x78e   : > { %v714_v59 = vsel %vm713_vm4, %v710_v35, %v712_v56  ;;  %v260_v35 = vmin.f32 %v1478_v54, 0.996 }
 0x78f   : > { %v717_v50 = vsel %vm715_vm5, %v716_v58, %v714_v59 }
 0x790   : > { %v718_v62 = vmax.f32 %v717_v50, 1e-15  ;;  %v261_v40 = vmul.f32 %v260_v35, %v260_v35 }
 0x792   : > { %v719_v63 = vmul.f32 %v718_v62, %v621_v61  ;;  %1152 = vrcp.f32 %v718_v62  ;;  %v296_v42 = vsub.f32 1.0, %v261_v40 }
 0x794   : > { %1154 = vtanh.f32 %v719_v63  ;;  %v298_v46 = vmul.f32 %v296_v42, %v1486_v6 }
 0x79f   : > { %v1153_v1 = vpop.eup %1152 }
 0x7a1   : > { %v1155_v2 = vpop.eup %1154 }
 0x7a2   : > { %v722_v8 = vmul.f32 %v1155_v2, %v1153_v1 }
 0x7a4   : > { %v723_v47 = vmul.f32 %v722_v8, %v717_v50 }
 0x7a6   : > { %v724_v14 = vmax.f32 %v723_v47, 1e-15 }
 0x7a8   : > { %1156 = vrcp.f32 %v724_v14  ;;  %vm725_vm6 = vcmp.gt.f32.partialorder %v724_v14, 0.996  ;;  %v731_v21 = vmin.f32 %v724_v14, 0.996 }
 0x7aa   : > { %v732_v22 = vmul.f32 %v731_v21, %v731_v21 }
 0x7ac   : > { %v746_v26 = vmul.f32 %v735_v25, %v732_v22  ;;  %v742_v28 = vsub.f32 1.0, %v732_v22 }
 0x7ae   : > { %v744_v32 = vmul.f32 %v742_v28, %v1457_v43 }
 0x7b5   : > { %v1157_v15 = vpop.eup %1156 }
 0x7b6   : > { %v727_v16 = vmul.f32 0.996, %v1157_v15 }
 0x7b8   : > { %v728_v18 = vsel %vm725_vm6, %v727_v16, 1.0 }
 0x7b9   : > { %v729_v17 = vmul.f32 %v728_v18, %v722_v8 }
 0x7bb   : > { %v730_v19 = vmul.f32 %v729_v17, %v1491_v20  ;;  %v287_v20 = vmul.f32 %v1486_v6, %v1486_v6 }
 0x7bd   : > { %v736_v49 = vmul.f32 %v730_v19, %v1457_v43 }
 0x7bf   : > { %737 = vadd.xlane.f32.xlu0 %v736_v49 }
 0x848   : > { %v738_v23 = vpop.xlane.xlu0 %737 }
 0x849   : > { %v739_v24 = vmul.f32 2.0, %v738_v23 }
 0x84b   : > { %v740_v27 = vadd.f32 1.0, %v739_v24 }
 0x84d   : > { %v741_v30 = vadd.f32 %v740_v27, %v735_v25  ;;  %v747_v39 = vadd.f32 %v746_v26, %v740_v27  ;;  %v326_v27 = vsub.s32 0, %v1443_v7 }
 0x84f   : > { %v743_v31 = vmul.f32 %v741_v30, %v730_v19  ;;  %v748_v29 = vmax.f32 %v747_v39, 1e-15  ;;  %v327_v30 = vrot.slane %v1388_v4, %v326_v27 }
 0x851   : > { %v745_v33 = vadd.f32 %v744_v32, %v743_v31 }
 0x853   : > { %v749_v34 = vmul.f32 %v745_v33, %v745_v33 }
 0x855   : > { %750 = vadd.xlane.f32.xlu0 %v749_v34 }
 0x859   : > { %288 = vadd.xlane.f32.xlu0 %v287_v20 }
 0x8de   : > { %v751_v36 = vpop.xlane.xlu0 %750 }
 0x8df   : > { %1158 = vrsqrt.f32 %v751_v36  ;;  %vm754_vm7 = vcmp.eq.f32.partialorder %v751_v36, inf  ;;  %v757_v53 = vand.u32 2147483648, %v751_v36  ;;  %vm756_vm8 = vcmp.eq.f32.partialorder %v751_v36, 0.0 }
 0x8e0   : > { %1160 = vrcp.f32 %v748_v29 }
 0x8e2   : > { %v289_v44 = vpop.xlane.xlu0 %288 }
 0x8e3   : > { %v295_v43 = vadd.f32 %v294_v41, %v289_v44  ;;  %v300_v15 = vmul.f32 %v289_v44, %v261_v40 }
 0x8e5   : > { %v297_v45 = vmul.f32 %v295_v43, %v1483_v5  ;;  %v772_v5 = vsub.s32 2, %v1443_v7  ;;  %v301_v16 = vadd.f32 %v300_v15, %v294_v41 }
 0x8e7   : > { %v1503_v48 = vadd.f32 %v298_v46, %v297_v45  ;;  %v773_v60 = vrot.slane %v1388_v4, %v772_v5  ;;  %v302_v17 = vmax.f32 %v301_v16, 1e-15 }
 0x8e9   : > { %v303_v54 = vmul.f32 %v1503_v48, %v1503_v48 }
 0x8eb   : > { %304 = vadd.xlane.f32.xlu1 %v303_v54 }
 0x8ec   : > { %v1159_v51 = vpop.eup %1158 }
 0x8ed   : > { %v753_v52 = vmul.f32 %v1159_v51, %v751_v36  ;;  %v1161_v56 = vpop.eup %1160  ;;  %v336_v51 = vrot.slane %v1394_v10, %v326_v27 }
 0x8ef   : > { %v755_v55 = vsel %vm754_vm7, %v751_v36, %v753_v52 }
 0x8f0   : > { %v758_v57 = vsel %vm756_vm8, %v757_v53, %v755_v55 }
 0x8f1   : > { %v760_v58 = vmul.f32 %v1161_v56, %v758_v57 }
 0x8f3   : > { %v761_v59 = vmax.f32 %v760_v58, 1e-15 }
 0x8f5   : > { %1162 = vrcp.f32 %v761_v59  ;;  %v768_v6 = vmin.f32 %v761_v59, 0.996  ;;  %vm762_vm9 = vcmp.gt.f32.partialorder %v761_v59, 0.996 }
 0x8f7   : > { %v769_v50 = vmul.f32 %v768_v6, %v768_v6 }
 0x8f9   : > { %v784_v61 = vsub.f32 1.0, %v769_v50 }
 0x8fb   : > { %v786_v62 = vmul.f32 %v784_v61, %v773_v60 }
 0x902   : > { %v1163_v63 = vpop.eup %1162 }
 0x903   : > { %v764_v1 = vmul.f32 0.996, %v1163_v63 }
 0x905   : > { %v765_v2 = vsel %vm762_vm9, %v764_v1, 1.0 }
 0x906   : > { %v766_v8 = vmul.f32 %v1161_v56, %v765_v2 }
 0x908   : > { %v767_v47 = vmul.f32 %v766_v8, %v745_v33  ;;  %v782_v33 = vrot.slane %v1392_v9, %v772_v5 }
 0x90a   : > { %v774_v14 = vmul.f32 %v773_v60, %v767_v47  ;;  %v788_v37 = vmul.f32 %v782_v33, %v769_v50 }
 0x90c   : > { %775 = vadd.xlane.f32.xlu0 %v774_v14 }
 0x974   : > { %v305_v18 = vpop.xlane.xlu1 %304 }
 0x975   : > { %1164 = vrsqrt.f32 %v305_v18  ;;  %vm308_vm10 = vcmp.eq.f32.partialorder %v305_v18, inf  ;;  %v311_v21 = vand.u32 2147483648, %v305_v18  ;;  %vm310_vm11 = vcmp.eq.f32.partialorder %v305_v18, 0.0 }
 0x976   : > { %1166 = vrcp.f32 %v302_v17 }
 0x982   : > { %v1165_v19 = vpop.eup %1164 }
 0x983   : > { %v307_v49 = vmul.f32 %v1165_v19, %v305_v18  ;;  %v1167_v23 = vpop.eup %1166 }
 0x985   : > { %v309_v22 = vsel %vm308_vm10, %v305_v18, %v307_v49  ;;  %v812_v18 = vsub.f32 0.0, %v1326_v13 }
 0x986   : > { %v312_v24 = vsel %vm310_vm11, %v311_v21, %v309_v22 }
 0x987   : > { %v314_v25 = vmul.f32 %v1167_v23, %v312_v24 }
 0x989   : > { %v315_v26 = vmax.f32 %v314_v25, 1e-15 }
 0x98b   : > { %1168 = vrcp.f32 %v315_v26  ;;  %v322_v28 = vmin.f32 %v315_v26, 0.996  ;;  %vm316_vm12 = vcmp.gt.f32.partialorder %v315_v26, 0.996 }
 0x98d   : > { %v323_v39 = vmul.f32 %v322_v28, %v322_v28 }
 0x98f   : > { %v338_v31 = vsub.f32 1.0, %v323_v39  ;;  %v342_v56 = vmul.f32 %v336_v51, %v323_v39 }
 0x991   : > { %v340_v32 = vmul.f32 %v338_v31, %v327_v30 }
 0x995   : > { %v776_v34 = vpop.xlane.xlu0 %775 }
 0x996   : > { %v777_v20 = vmul.f32 2.0, %v776_v34 }
 0x998   : > { %v1169_v35 = vpop.eup %1168  ;;  %v778_v38 = vadd.f32 1.0, %v777_v20 }
 0x999   : > { %v318_v40 = vmul.f32 0.996, %v1169_v35 }
 0x99a   : > { %v783_v36 = vadd.f32 %v782_v33, %v778_v38  ;;  %v789_v29 = vadd.f32 %v788_v37, %v778_v38  ;;  %v819_v37 = vsub.f32 1.0, %v1322_v12 }
 0x99b   : > { %v319_v41 = vsel %vm316_vm12, %v318_v40, 1.0 }
 0x99c   : > { %v785_v42 = vmul.f32 %v783_v36, %v767_v47  ;;  %v320_v7 = vmul.f32 %v1167_v23, %v319_v41  ;;  %v790_v53 = vmax.f32 %v789_v29, 1e-15 }
 0x99e   : > { %v321_v44 = vmul.f32 %v320_v7, %v1503_v48  ;;  %v787_v43 = vadd.f32 %v786_v62, %v785_v42 }
 0x9a0   : > { %v328_v45 = vmul.f32 %v327_v30, %v321_v44  ;;  %v791_v46 = vmul.f32 %v787_v43, %v787_v43 }
 0x9a2   : > { %329 = vadd.xlane.f32.xlu0 %v328_v45  ;;  %792 = vadd.xlane.f32.xlu1 %v791_v46 }
 0xa2b   : > { %v793_v54 = vpop.xlane.xlu1 %792  ;;  %v330_v52 = vpop.xlane.xlu0 %329 }
 0xa2c   : > { %1170 = vrsqrt.f32 %v793_v54  ;;  %v331_v55 = vmul.f32 2.0, %v330_v52  ;;  %vm796_vm13 = vcmp.eq.f32.partialorder %v793_v54, inf  ;;  %v799_v61 = vand.u32 2147483648, %v793_v54 }
 0xa2d   : > { %1172 = vrcp.f32 %v790_v53  ;;  %vm798_vm14 = vcmp.eq.f32.partialorder %v793_v54, 0.0 }
 0xa2e   : > { %v332_v57 = vadd.f32 1.0, %v331_v55 }
 0xa30   : > { %v337_v58 = vadd.f32 %v336_v51, %v332_v57  ;;  %v343_v59 = vadd.f32 %v342_v56, %v332_v57 }
 0xa32   : > { %v339_v5 = vmul.f32 %v337_v58, %v321_v44  ;;  %v344_v21 = vmax.f32 %v343_v59, 1e-15 }
 0xa34   : > { %v1514_v6 = vadd.f32 %v340_v32, %v339_v5 }
 0xa36   : > { %v345_v48 = vmul.f32 %v1514_v6, %v1514_v6 }
 0xa38   : > { %346 = vadd.xlane.f32.xlu1 %v345_v48 }
 0xa39   : > { %v1171_v60 = vpop.eup %1170 }
 0xa3a   : > { %v795_v50 = vmul.f32 %v1171_v60, %v793_v54  ;;  %v1173_v63 = vpop.eup %1172 }
 0xa3c   : > { %v797_v62 = vsel %vm796_vm13, %v793_v54, %v795_v50 }
 0xa3d   : > { %v800_v1 = vsel %vm798_vm14, %v799_v61, %v797_v62 }
 0xa3e   : > { %v802_v2 = vmul.f32 %v1173_v63, %v800_v1 }
 0xa40   : > { %v803_v8 = vmax.f32 %v802_v2, 1e-15 }
 0xa42   : > { %1174 = vrcp.f32 %v803_v8  ;;  %vm804_vm15 = vcmp.gt.f32.partialorder %v803_v8, 0.996  ;;  %v810_v32 = vmin.f32 %v803_v8, 0.996 }
 0xa44   : > { %v811_v20 = vmul.f32 %v810_v32, %v810_v32 }
 0xa4f   : > { %v1175_v47 = vpop.eup %1174 }
 0xa50   : > { %v806_v14 = vmul.f32 0.996, %v1175_v47 }
 0xa52   : > { %v807_v15 = vsel %vm804_vm15, %v806_v14, 1.0 }
 0xa53   : > { %v808_v16 = vmul.f32 %v1173_v63, %v807_v15 }
 0xa55   : > { %v809_v17 = vmul.f32 %v808_v16, %v787_v43 }
 0xa57   : > { %v813_v19 = vmul.f32 %v812_v18, %v809_v17  ;;  %v821_v41 = vmul.f32 %v819_v37, %v809_v17 }
 0xa59   : > { %814 = vadd.xlane.f32.xlu0 %v813_v19 }
 0xac1   : > { %v347_v49 = vpop.xlane.xlu1 %346 }
 0xac2   : > { %1176 = vrsqrt.f32 %v347_v49  ;;  %vm350_vm0 = vcmp.eq.f32.partialorder %v347_v49, inf  ;;  %v353_v24 = vand.u32 2147483648, %v347_v49  ;;  %vm352_vm1 = vcmp.eq.f32.partialorder %v347_v49, 0.0 }
 0xac3   : > { %1178 = vrcp.f32 %v344_v21 }
 0xacf   : > { %v1177_v22 = vpop.eup %1176 }
 0xad0   : > { %v349_v23 = vmul.f32 %v1177_v22, %v347_v49  ;;  %v1179_v26 = vpop.eup %1178 }
 0xad2   : > { %v351_v25 = vsel %vm350_vm0, %v347_v49, %v349_v23 }
 0xad3   : > { %v354_v27 = vsel %vm352_vm1, %v353_v24, %v351_v25 }
 0xad4   : > { %v356_v28 = vmul.f32 %v1179_v26, %v354_v27 }
 0xad6   : > { %v357_v30 = vmax.f32 %v356_v28, 1e-15  ;;  %v823_v28 = vmul.f32 %v1322_v12, %v811_v20 }
 0xad8   : > { %1180 = vrcp.f32 %v357_v30  ;;  %v364_v39 = vmin.f32 %v357_v30, 0.996  ;;  %vm358_vm2 = vcmp.gt.f32.partialorder %v357_v30, 0.996 }
 0xada   : > { %v365_v31 = vmul.f32 %v364_v39, %v364_v39 }
 0xadc   : > { %1182 = vrsqrt.f32 %v365_v31  ;;  %vm368_vm3 = vcmp.eq.f32.partialorder %v365_v31, inf  ;;  %v371_v46 = vand.u32 2147483648, %v365_v31  ;;  %vm370_vm4 = vcmp.eq.f32.partialorder %v365_v31, 0.0 }
 0xae2   : > { %v815_v33 = vpop.xlane.xlu0 %814 }
 0xae3   : > { %v816_v34 = vmul.f32 2.0, %v815_v33 }
 0xae5   : > { %v817_v35 = vadd.f32 1.0, %v816_v34  ;;  %v1181_v38 = vpop.eup %1180 }
 0xae6   : > { %v360_v36 = vmul.f32 0.996, %v1181_v38 }
 0xae7   : > { %v818_v40 = vadd.f32 %v817_v35, %v811_v20  ;;  %v824_v30 = vadd.f32 %v823_v28, %v817_v35 }
 0xae8   : > { %v361_v42 = vsel %vm358_vm2, %v360_v36, 1.0 }
 0xae9   : > { %v820_v29 = vmul.f32 %v818_v40, %v812_v18  ;;  %v1183_v7 = vpop.eup %1182  ;;  %v362_v44 = vmul.f32 %v1179_v26, %v361_v42 }
 0xaea   : > { %v367_v45 = vmul.f32 %v1183_v7, %v365_v31 }
 0xaeb   : > { %v1522_v43 = vadd.f32 %v821_v41, %v820_v29  ;;  %v363_v19 = vmul.f32 %v362_v44, %v1514_v6 }
 0xaec   : > { %v369_v51 = vsel %vm368_vm3, %v365_v31, %v367_v45  ;;  %v825_v31 = vmax.f32 %v824_v30, 1e-15 }
 0xaed   : > { %v826_v54 = vmul.f32 %v1522_v43, %v1522_v43  ;;  %v372_v52 = vsel %vm370_vm4, %v371_v46, %v369_v51 }
 0xaee   : > { %v373_v53 = vmax.f32 %v372_v52, 1e-15 }
 0xaef   : > { %827 = vadd.xlane.f32.xlu1 %v826_v54 }
 0xaf0   : > { %v980_v55 = vclamps-f32 %v373_v53, 0.9999999 }
 0xaf2   : > { %v376_v56 = vadd.f32 1.0, %v980_v55  ;;  %v385_v57 = vsub.f32 0.0, %v980_v55  ;;  %v379_v59 = vmul.f32 -0.5, %v980_v55  ;;  %v382_v61 = vand.u32 2147483647, %v980_v55 }
 0xaf4   : > { %1184 = vlog2.f32 %v376_v56  ;;  %v386_v58 = vadd.f32 1.0, %v385_v57  ;;  %v389_v5 = vmul.f32 -0.5, %v385_v57  ;;  %v380_v48 = vadd.f32 1.0, %v379_v59 }
 0xaf5   : > { %v392_v62 = vand.u32 2147483647, %v385_v57  ;;  %vm383_vm5 = vcmp.lt.f32.partialorder %v382_v61, 0.0004427343 }
 0xaf6   : > { %1186 = vlog2.f32 %v386_v58  ;;  %v390_v60 = vadd.f32 1.0, %v389_v5  ;;  %v381_v2 = vmul.f32 %v980_v55, %v380_v48 }
 0xaf7   : > { %1188 = vrcp.f32 %v373_v53  ;;  %vm393_vm6 = vcmp.lt.f32.partialorder %v392_v62, 0.0004427343 }
 0xaf8   : > { %v391_v47 = vmul.f32 %v390_v60, %v385_v57 }
 0xb01   : > { %v1185_v50 = vpop.eup %1184 }
 0xb02   : > { %v378_v63 = vmul.f32 0.6931472, %v1185_v50 }
 0xb03   : > { %v1187_v1 = vpop.eup %1186 }
 0xb04   : > { %v388_v8 = vmul.f32 0.6931472, %v1187_v1  ;;  %v384_v14 = vsel %vm383_vm5, %v381_v2, %v378_v63  ;;  %v1189_v17 = vpop.eup %1188 }
 0xb06   : > { %v394_v15 = vsel %vm393_vm6, %v391_v47, %v388_v8 }
 0xb07   : > { %v395_v16 = vsub.f32 %v384_v14, %v394_v15 }
 0xb09   : > { %v396_v18 = vmul.f32 0.5, %v395_v16 }
 0xb0b   : > { %v398_v49 = vmul.f32 %v1189_v17, %v396_v18 }
 0xb0d   : > { %v399_v21 = vmul.f32 %v398_v49, %v363_v19 }
 0xb0f   : > { %v981_v22 = vmul.f32 -1.442695, %v399_v21 }
 0xb11   : > { %1190 = vpow2.f32 %v981_v22 }
 0xb1e   : > { %v1191_v23 = vpop.eup %1190 }
 0xb1f   : > { %v403_v24 = vadd.f32 1.0, %v1191_v23 }
 0xb21   : > { %1192 = vrcp.f32 %v403_v24 }
 0xb2e   : > { %v1193_v25 = vpop.eup %1192 }
 0xb2f   : > { %v525_v26 = vmul.f32 %v1193_v25, %v1383_v3 }
 0xb31   : > { %v845_v27 = vmul.f32 %v525_v26, %v525_v26 }
 0xb33   : > { %846 = vadd.xlane.f32.xlu0 %v845_v27 }
 0xb78   : > { %v828_v39 = vpop.xlane.xlu1 %827 }
 0xb79   : > { %1194 = vrsqrt.f32 %v828_v39  ;;  %vm831_vm7 = vcmp.eq.f32.partialorder %v828_v39, inf  ;;  %v834_v33 = vand.u32 2147483648, %v828_v39  ;;  %vm833_vm8 = vcmp.eq.f32.partialorder %v828_v39, 0.0 }
 0xb7a   : > { %1196 = vrcp.f32 %v825_v31 }
 0xb86   : > { %v1195_v6 = vpop.eup %1194 }
 0xb87   : > { %v830_v32 = vmul.f32 %v1195_v6, %v828_v39  ;;  %v1197_v38 = vpop.eup %1196 }
 0xb89   : > { %v832_v34 = vsel %vm831_vm7, %v828_v39, %v830_v32 }
 0xb8a   : > { %v835_v40 = vsel %vm833_vm8, %v834_v33, %v832_v34 }
 0xb8b   : > { %v837_v36 = vmul.f32 %v1197_v38, %v835_v40 }
 0xb8d   : > { %v838_v29 = vmax.f32 %v837_v36, 1e-15 }
 0xb8f   : > { %1198 = vrcp.f32 %v838_v29  ;;  %vm839_vm9 = vcmp.gt.f32.partialorder %v838_v29, 0.996 }
 0xb9c   : > { %v1199_v41 = vpop.eup %1198 }
 0xb9d   : > { %v841_v42 = vmul.f32 0.996, %v1199_v41 }
 0xb9f   : > { %v842_v20 = vsel %vm839_vm9, %v841_v42, 1.0 }
 0xba0   : > { %v843_v35 = vmul.f32 %v1197_v38, %v842_v20 }
 0xba2   : > { %v844_v7 = vmul.f32 %v843_v35, %v1522_v43 }
 0xba4   : > { %v1530_v44 = vmul.f32 %v844_v7, %v525_v26 }
 0xba6   : > { %v882_v45 = vmul.f32 %v1530_v44, %v1530_v44 }
 0xba8   : > { %883 = vadd.xlane.f32.xlu1 %v882_v45 }
 0xbbc   : > { %v847_v46 = vpop.xlane.xlu0 %846 }
 0xbbd   : > { %1200 = vrsqrt.f32 %v847_v46  ;;  %vm850_vm10 = vcmp.eq.f32.partialorder %v847_v46, inf  ;;  %v853_v53 = vand.u32 2147483648, %v847_v46  ;;  %vm852_vm11 = vcmp.eq.f32.partialorder %v847_v46, 0.0 }
 0xbca   : > { %v1201_v54 = vpop.eup %1200 }
 0xbcb   : > { %v849_v51 = vmul.f32 %v1201_v54, %v847_v46 }
 0xbcd   : > { %v851_v52 = vsel %vm850_vm10, %v847_v46, %v849_v51 }
 0xbce   : > { %v854_v55 = vsel %vm852_vm11, %v853_v53, %v851_v52 }
 0xbcf   : > { %v855_v56 = vmax.f32 %v854_v55, 1e-15 }
 0xbd1   : > { %v986_v57 = vclamps-f32 %v855_v56, 0.9999999 }
 0xbd3   : > { %v867_v58 = vsub.f32 0.0, %v986_v57  ;;  %v858_v43 = vadd.f32 1.0, %v986_v57  ;;  %v861_v60 = vmul.f32 -0.5, %v986_v57  ;;  %v864_v8 = vand.u32 2147483647, %v986_v57 }
 0xbd5   : > { %v868_v59 = vadd.f32 1.0, %v867_v58  ;;  %v871_v5 = vmul.f32 -0.5, %v867_v58  ;;  %v874_v63 = vand.u32 2147483647, %v867_v58  ;;  %v862_v1 = vadd.f32 1.0, %v861_v60 }
 0xbd6   : > { %vm865_vm13 = vcmp.lt.f32.partialorder %v864_v8, 0.0004427343 }
 0xbd7   : > { %1202 = vlog2.f32 %v868_v59  ;;  %v872_v61 = vadd.f32 1.0, %v871_v5  ;;  %vm875_vm12 = vcmp.lt.f32.partialorder %v874_v63, 0.0004427343  ;;  %v863_v15 = vmul.f32 %v986_v57, %v862_v1 }
 0xbd8   : > { %1204 = vlog2.f32 %v858_v43 }
 0xbd9   : > { %v873_v14 = vmul.f32 %v872_v61, %v867_v58 }
 0xbe4   : > { %v1203_v50 = vpop.eup %1202 }
 0xbe5   : > { %v1205_v62 = vpop.eup %1204  ;;  %v870_v2 = vmul.f32 0.6931472, %v1203_v50 }
 0xbe6   : > { %v860_v47 = vmul.f32 0.6931472, %v1205_v62 }
 0xbe7   : > { %v876_v16 = vsel %vm875_vm12, %v873_v14, %v870_v2 }
 0xbe8   : > { %v866_v18 = vsel %vm865_vm13, %v863_v15, %v860_v47 }
 0xbe9   : > { %v877_v17 = vsub.f32 %v866_v18, %v876_v16 }
 0xbeb   : > { %v878_v21 = vmul.f32 0.5, %v877_v17 }
 0xc31   : > { %v884_v48 = vpop.xlane.xlu1 %883 }
 0xc32   : > { %1206 = vrsqrt.f32 %v884_v48  ;;  %vm887_vm14 = vcmp.eq.f32.partialorder %v884_v48, inf  ;;  %v890_v22 = vand.u32 2147483648, %v884_v48  ;;  %vm889_vm15 = vcmp.eq.f32.partialorder %v884_v48, 0.0 }
 0xc33   : > { %1208 = vrcp.f32 %v855_v56 }
 0xc3f   : > { %v1207_v19 = vpop.eup %1206 }
 0xc40   : > { %v886_v49 = vmul.f32 %v1207_v19, %v884_v48  ;;  %v1209_v24 = vpop.eup %1208 }
 0xc41   : > { %v880_v26 = vmul.f32 %v1209_v24, %v878_v21 }
 0xc42   : > { %v888_v23 = vsel %vm887_vm14, %v884_v48, %v886_v49 }
 0xc43   : > { %v891_v25 = vsel %vm889_vm15, %v890_v22, %v888_v23 }
 0xc44   : > { %v892_v27 = vmax.f32 %v891_v25, 1e-15 }
 0xc46   : > { %v893_v28 = vmul.f32 %v892_v27, %v880_v26  ;;  %1210 = vrcp.f32 %v892_v27 }
 0xc48   : > { %1212 = vtanh.f32 %v893_v28 }
 0xc53   : > { %v1211_v30 = vpop.eup %1210 }
 0xc55   : > { %v1213_v39 = vpop.eup %1212 }
 0xc56   : > { %v896_v31 = vmul.f32 %v1213_v39, %v1211_v30 }
 0xc58   : > { %v897_v6 = vmul.f32 %v896_v31, %v891_v25 }
 0xc5a   : > { %v898_v32 = vmax.f32 %v897_v6, 1e-15 }
 0xc5c   : > { %1214 = vrcp.f32 %v898_v32  ;;  %vm899_vm0 = vcmp.gt.f32.partialorder %v898_v32, 0.996  ;;  %v905_v41 = vmin.f32 %v898_v32, 0.996 }
 0xc5e   : > { %v906_v35 = vmul.f32 %v905_v41, %v905_v41 }
 0xc60   : > { %v916_v53 = vmul.f32 %v1322_v12, %v906_v35 }
 0xc69   : > { %v1215_v33 = vpop.eup %1214 }
 0xc6a   : > { %v901_v34 = vmul.f32 0.996, %v1215_v33 }
 0xc6c   : > { %v902_v38 = vsel %vm899_vm0, %v901_v34, 1.0 }
 0xc6d   : > { %v903_v40 = vmul.f32 %v902_v38, %v896_v31 }
 0xc6f   : > { %v904_v36 = vmul.f32 %v903_v40, %v1530_v44 }
 0xc71   : > { %v907_v29 = vmul.f32 %v1326_v13, %v904_v36  ;;  %v914_v54 = vmul.f32 %v904_v36, %v819_v37 }
 0xc73   : > { %908 = vadd.xlane.f32.xlu0 %v907_v29 }
 0xcfc   : > { %v909_v42 = vpop.xlane.xlu0 %908 }
 0xcfd   : > { %v910_v20 = vmul.f32 2.0, %v909_v42 }
 0xcff   : > { %v911_v7 = vadd.f32 1.0, %v910_v20 }
 0xd01   : > { %v912_v45 = vadd.f32 %v911_v7, %v906_v35  ;;  %v917_v44 = vadd.f32 %v916_v53, %v911_v7 }
 0xd03   : > { %v913_v46 = vmul.f32 %v1326_v13, %v912_v45  ;;  %v918_v56 = vmax.f32 %v917_v44, 1e-15 }
 0xd05   : > { %v915_v51 = vadd.f32 %v914_v54, %v913_v46 }
 0xd07   : > { %v919_v52 = vmul.f32 %v915_v51, %v915_v51 }
 0xd09   : > { %920 = vadd.xlane.f32.xlu1 %v919_v52 }
 0xd92   : > { %v921_v55 = vpop.xlane.xlu1 %920 }
 0xd93   : > { %1216 = vrsqrt.f32 %v921_v55  ;;  %vm924_vm1 = vcmp.eq.f32.partialorder %v921_v55, inf  ;;  %v927_v59 = vand.u32 2147483648, %v921_v55  ;;  %vm926_vm2 = vcmp.eq.f32.partialorder %v921_v55, 0.0 }
 0xd94   : > { %1218 = vrcp.f32 %v918_v56 }
 0xda0   : > { %v1217_v57 = vpop.eup %1216 }
 0xda1   : > { %v923_v58 = vmul.f32 %v1217_v57, %v921_v55  ;;  %v1219_v13 = vpop.eup %1218 }
 0xda3   : > { %v925_v43 = vsel %vm924_vm1, %v921_v55, %v923_v58 }
 0xda4   : > { %v928_v5 = vsel %vm926_vm2, %v927_v59, %v925_v43 }
 0xda5   : > { %v930_v37 = vmul.f32 %v1219_v13, %v928_v5 }
 0xda7   : > { %v931_v48 = vmax.f32 %v930_v37, 1e-15 }
 0xda9   : > { %1220 = vrcp.f32 %v931_v48  ;;  %v938_v60 = vmin.f32 %v931_v48, 0.996  ;;  %vm932_vm3 = vcmp.gt.f32.partialorder %v931_v48, 0.996 }
 0xdab   : > { %v939_v12 = vmul.f32 %v938_v60, %v938_v60  }
 0xdb6   : > { %v1221_v50 = vpop.eup %1220 }
 0xdb7   : > { %v934_v61 = vmul.f32 0.996, %v1221_v50 }
 0xdb9   : > { %v935_v62 = vsel %vm932_vm3, %v934_v61, 1.0 }
 0xdba   : > { %v936_v63 = vmul.f32 %v1219_v13, %v935_v62  ;;  %91 = sbr.rel (!%p89_p1) target bundleno = 187 (0xbb), region = 61 }
 0xdbc   : > { %v937_v13 = vmul.f32 %v936_v63, %v915_v51  }
 0xdbe   : > { %942 = vst [vmem:[%s941_s12] sm:$0xff] %v937_v13 }
 0xdbf   :  { %1293 = shalt.err (!%p1290_p6)
}
 0xdc0   :  { %955 = dma.vmem_to_hbm [thread:$0]  %s950_s14, 1024, %s1558_s4, [#allocation5], %s1339_s5, %s1339_s5, %s1340_s6  }
 0xdc1   :  { %1318 = dma.done.wait [#allocation5], 1024  }
 0xdc2   :  { %1319 = vsyncadd [#allocation5], 4294966272 }
 0xdc3   :  { %959 = vsyncpa [#allocation4], 1 }
 0xdc4   :  { %960 = vsyncpa [#allocation7], 1 }
 0xdc5   :  { %961 = vsyncpa [#allocation5], 1 }

</bundles_post_ra>
